<compile_context>
chip_gen: v7x
topology: tpu7x:2x2x1
jax: 0.10.0
libtpu: 0.0.40
codegen_flags: <defaults>
</compile_context>

<pallas_src>
import functools

import jax
import jax.numpy as jnp
import numpy as np
from jax.experimental import pallas as pl
from jax.experimental.pallas import tpu as pltpu

_LANE = 128
_TN_CANDIDATES = (4096, 2048, 1024, 512, 256, 128, 64, 32, 16)


# ---------------------------------------------------------------------------
# Kernel
# ---------------------------------------------------------------------------
def mgcmlp_kernel(
    x0_ref, x1_ref,                       # (TN, F) bf16 activation tiles
    w10_ref, b10_ref, w20_ref, b20_ref,   # branch 0 (BN + coff folded), bf16/f32
    w11_ref, b11_ref, w21_ref, b21_ref,   # branch 1
    w3_ref, b3_ref,                       # penultimate Linear (Hp -> Hp)
    w4_ref, b4_ref,                       # output Linear (Hp -> Cp), zero-padded
    out_ref,                              # (TN, Cp) bf16, lane-dense
):
    bf16 = jnp.bfloat16

    def branch(x, w1, b1, w2, b2):
        # Linear -> BN(eval, folded into w1/b1) -> ReLU -> Dropout(id) -> Linear -> ReLU
        h = jnp.dot(x, w1[...], preferred_element_type=jnp.float32)   # x already bf16
        h = jnp.maximum(h + b1[...], 0.0)
        h = jnp.dot(h.astype(bf16), w2[...], preferred_element_type=jnp.float32)
        # coffs[i] is folded into w2/b2 (valid because coffs >= 0).
        return jnp.maximum(h + b2[...], 0.0)

    # Accumulate branches sequentially (one live (TN, Hp) intermediate).
    acc = branch(x0_ref[...], w10_ref, b10_ref, w20_ref, b20_ref)
    acc = acc + branch(x1_ref[...], w11_ref, b11_ref, w21_ref, b21_ref)

    y = jnp.dot(acc.astype(bf16), w3_ref[...], preferred_element_type=jnp.float32)
    y = jnp.maximum(y + b3_ref[...], 0.0)

    out = jnp.dot(y.astype(bf16), w4_ref[...], preferred_element_type=jnp.float32)
    out_ref[...] = (out + b4_ref[...]).astype(out_ref.dtype)


# ---------------------------------------------------------------------------
# Parameter / input preparation (folding + padding + bf16 cast) -- host side
# ---------------------------------------------------------------------------
def _pad_to(n, m):
    return ((n + m - 1) // m) * m


def _pad2(a, rows, cols):
    return jnp.pad(a, ((0, rows - a.shape[0]), (0, cols - a.shape[1])))


def prepare_params(raw, coffs, eps=1e-5):
    """Fold BatchNorm (eval) into Linear1 and coffs into Linear2, zero-pad the
    H / C feature dims to lane (128) multiples, cast matmul weights to bf16.
    The input-feature dim F is left unpadded (full-extent blocks are exempt
    from the lane rule and the MXU accepts arbitrary K).
    Returns (kernel_params, n_classes)."""
    c = np.asarray(coffs, dtype=np.float64)
    assert np.all(c >= 0.0), "coff folding (c*relu(z)=relu(c*z)) requires c >= 0"

    F, H = raw["w10"].shape
    C = raw["w4"].shape[1]
    Hp, Cp = _pad_to(H, _LANE), _pad_to(C, _LANE)

    out = {}
    for i in range(2):
        w1, b1 = raw[f"w1{i}"], raw[f"b1{i}"]
        w2, b2 = raw[f"w2{i}"], raw[f"b2{i}"]
        sc = raw[f"gamma{i}"] / jnp.sqrt(raw[f"var{i}"] + eps)   # BN eval scale
        sh = raw[f"beta{i}"] - raw[f"mean{i}"] * sc              # BN eval shift
        w1f = w1 * sc[None, :]
        b1f = b1 * sc[None, :] + sh[None, :]
        w2f = coffs[i] * w2
        b2f = coffs[i] * b2
        out[f"w1{i}"] = _pad2(w1f, F, Hp).astype(jnp.bfloat16)
        out[f"b1{i}"] = _pad2(b1f, 1, Hp).astype(jnp.float32)
        out[f"w2{i}"] = _pad2(w2f, Hp, Hp).astype(jnp.bfloat16)
        out[f"b2{i}"] = _pad2(b2f, 1, Hp).astype(jnp.float32)

    out["w3"] = _pad2(raw["w3"], Hp, Hp).astype(jnp.bfloat16)
    out["b3"] = _pad2(raw["b3"], 1, Hp).astype(jnp.float32)
    out["w4"] = _pad2(raw["w4"], Hp, Cp).astype(jnp.bfloat16)
    out["b4"] = _pad2(raw["b4"], 1, Cp).astype(jnp.float32)
    return out, int(C)


def prepare_inputs(*xs):
    """Cast activations to bf16 once, at data-prep time (outside the jitted
    forward), so the kernel's dominant HBM stream is half-width."""
    return tuple(x.astype(jnp.bfloat16) for x in xs)


# ---------------------------------------------------------------------------
# Generation-aware tiling / VMEM sizing helpers
# ---------------------------------------------------------------------------
def _vmem_capacity_bytes():
    try:
        return int(pltpu.get_tpu_info().vmem_capacity_bytes)
    except Exception:
        return 64 << 20          # conservative fallback (v7x per-TC VMEM)


def _num_tensorcores():
    """Best-effort count of TensorCores sharing a 'parallel' grid axis."""
    try:
        kind = jax.devices()[0].device_kind.lower()
    except Exception:
        return 1
    return 2 if ("v7" in kind or "v5p" in kind or "v4" in kind) else 1


def _default_tn(n_rows, num_cores):
    """Row-tile policy.

    Single-TC chips (v5e/v6e): the grid is a serial loop, weights are fully
    resident, so one big tile amortizes the ~0.35us per-step overhead.
    Two-TC chips (v7x): pick the largest tile that gives an even number of
    grid steps so megacore sharding is balanced."""
    if num_cores <= 1:
        if n_rows <= 2048:
            return n_rows
        for cand in _TN_CANDIDATES:
            if n_rows % cand == 0:
                return cand
        return n_rows            # awkward N: single full-extent block is legal
    for cand in _TN_CANDIDATES:
        if n_rows % cand == 0 and (n_rows // cand) % 2 == 0:
            return cand
    return n_rows                # fall back to a single step


# ---------------------------------------------------------------------------
# Wrapper
# ---------------------------------------------------------------------------
@functools.partial(jax.jit, static_argnames=("n_classes", "tn", "out_dtype"))
def mgcmlp_forward(x0, x1, params, *, n_classes, tn=None, out_dtype=jnp.bfloat16):
    N, F = x0.shape
    Hp = params["w10"].shape[1]
    Cp = params["w4"].shape[1]

    # Activations should already be bf16 (see prepare_inputs); fall back to an
    # in-graph cast if they are not (adds one extra HBM pass).
    if x0.dtype != jnp.bfloat16:
        x0 = x0.astype(jnp.bfloat16)
    if x1.dtype != jnp.bfloat16:
        x1 = x1.astype(jnp.bfloat16)

    ordered = (
        params["w10"], params["b10"], params["w20"], params["b20"],
        params["w11"], params["b11"], params["w21"], params["b21"],
        params["w3"], params["b3"], params["w4"], params["b4"],
    )
    weight_bytes = sum(int(np.prod(p.shape)) * p.dtype.itemsize for p in ordered)

    num_cores = _num_tensorcores()
    capacity = _vmem_capacity_bytes()
    budget = int(0.8 * capacity)       # headroom for compiler-internal scratch
    out_itemsize = jnp.dtype(out_dtype).itemsize

    def step_bytes(t):
        # Double-buffered bf16 x tiles (x2 inputs) + out tile, plus the
        # compiler-managed per-step intermediates: h/acc/y in f32 and their
        # bf16 cast copies (generous 4x factor).
        io = 2 * (2 * t * F * 2 + t * Cp * out_itemsize)
        interm = 4 * t * Hp * (4 + 2)
        return io + interm

    auto_tn = tn is None
    tn = _default_tn(N, num_cores) if auto_tn else tn
    if auto_tn:
        # Shrink the tile if the estimated footprint would bust the budget
        # (halving a divisor of N keeps it a divisor).
        while (tn > 16 and tn % 2 == 0
               and weight_bytes + step_bytes(tn) + (4 << 20) > budget):
            tn //= 2

    assert N % tn == 0, f"N={N} must be divisible by tn={tn}"
    assert tn == N or tn % 8 == 0, f"tn={tn} must be a multiple of 8"

    def weight_spec(shape):
        # Constant index map across the grid -> single resident copy is enough;
        # double-buffering weights would just double their VMEM cost.
        return pl.BlockSpec(shape, lambda i, _nd=len(shape): (0,) * _nd,
                            pipeline_mode=pl.Buffered(1))

    # NOTE: if a trace ever shows exposed DMA on the x/out streams (large tn,
    # right at the HBM roofline), bump these two activation specs and the
    # out_spec to pipeline_mode=pl.Buffered(3); weights stay Buffered(1).
    in_specs = [
        pl.BlockSpec((tn, F), lambda i: (i, 0)),   # x0 tile (bf16, F unpadded)
        pl.BlockSpec((tn, F), lambda i: (i, 0)),   # x1 tile
    ] + [weight_spec(p.shape) for p in ordered]

    out_spec = pl.BlockSpec((tn, Cp), lambda i: (i, 0))

    vmem_limit = int(min(max(weight_bytes + step_bytes(tn) + (4 << 20), 32 << 20),
                         budget))

    out_padded = pl.pallas_call(
        mgcmlp_kernel,
        out_shape=jax.ShapeDtypeStruct((N, Cp), out_dtype),
        grid_spec=pltpu.PrefetchScalarGridSpec(
            num_scalar_prefetch=0,
            grid=(N // tn,),
            in_specs=in_specs,
            out_specs=out_spec,
        ),
        compiler_params=pltpu.CompilerParams(
            dimension_semantics=("parallel",),
            vmem_limit_bytes=vmem_limit,
        ),
    )(x0, x1, *ordered)

    return out_padded[:, :n_classes]


# ---------------------------------------------------------------------------
# References
# ---------------------------------------------------------------------------
def ref_forward_f32(x0, x1, raw, coffs, eps=1e-5):
    """Pure-f32 JAX reference matching the PyTorch eval-mode forward exactly."""
    def branch(x, w1, b1, g, b, mu, var, w2, b2):
        h = x @ w1 + b1
        h = (h - mu) / jnp.sqrt(var + eps) * g + b      # BatchNorm1d (running stats)
        h = jnp.maximum(h, 0.0)                         # ReLU (Dropout identity)
        h = h @ w2 + b2
        return jnp.maximum(h, 0.0)                      # outer self.activation

    sumx = coffs[0] * branch(x0, raw["w10"], raw["b10"], raw["gamma0"], raw["beta0"],
                             raw["mean0"], raw["var0"], raw["w20"], raw["b20"])
    sumx = sumx + coffs[1] * branch(x1, raw["w11"], raw["b11"], raw["gamma1"],
                                    raw["beta1"], raw["mean1"], raw["var1"],
                                    raw["w21"], raw["b21"])
    y = jnp.maximum(sumx @ raw["w3"] + raw["b3"], 0.0)
    return y @ raw["w4"] + raw["b4"]


def ref_forward_prepared(x0, x1, p, n_classes, out_dtype=jnp.bfloat16):
    """Reference mirroring the kernel math exactly (folded params, bf16 matmul
    operands, f32 accumulation, bf16 output) -- used for a tight check."""
    bf16 = jnp.bfloat16
    x0 = x0.astype(bf16)
    x1 = x1.astype(bf16)

    def dot(a, w):
        return jnp.dot(a.astype(bf16), w, preferred_element_type=jnp.float32)

    def branch(x, w1, b1, w2, b2):
        h = jnp.maximum(dot(x, w1) + b1, 0.0)
        return jnp.maximum(dot(h, w2) + b2, 0.0)

    acc = branch(x0, p["w10"], p["b10"], p["w20"], p["b20"])
    acc = acc + branch(x1, p["w11"], p["b11"], p["w21"], p["b21"])
    y = jnp.maximum(dot(acc, p["w3"]) + p["b3"], 0.0)
    out = (dot(y, p["w4"]) + p["b4"]).astype(out_dtype)
    return out[:, :n_classes]


# ---------------------------------------------------------------------------
# Synthetic init (shapes follow the module's __init__)
# ---------------------------------------------------------------------------
def init_raw_params(key, n_feat, n_hid, n_classes):
    """Linear weights stored transposed ([in, out]) so the kernel does x @ W.
    BatchNorm running stats are non-trivial so the folding path is exercised."""
    ks = jax.random.split(key, 20)
    it = iter(ks)

    def lin(fan_in, fan_out, scale):
        return scale * jax.random.normal(next(it), (fan_in, fan_out), jnp.float32)

    def bias(n, scale=0.01):
        return scale * jax.random.normal(next(it), (1, n), jnp.float32)

    raw = {}
    for i in range(2):
        raw[f"w1{i}"] = lin(n_feat, n_hid, 1.0 / np.sqrt(n_feat))
        raw[f"b1{i}"] = bias(n_hid)
        raw[f"gamma{i}"] = 0.5 + jax.random.uniform(next(it), (n_hid,), jnp.float32)
        raw[f"beta{i}"] = 0.1 * jax.random.normal(next(it), (n_hid,), jnp.float32)
        raw[f"mean{i}"] = 0.1 * jax.random.normal(next(it), (n_hid,), jnp.float32)
        raw[f"var{i}"] = 0.5 + jax.random.uniform(next(it), (n_hid,), jnp.float32)
        raw[f"w2{i}"] = lin(n_hid, n_hid, 1.0 / np.sqrt(n_hid))
        raw[f"b2{i}"] = bias(n_hid)
    raw["w3"] = lin(n_hid, n_hid, 1.0 / np.sqrt(n_hid))
    raw["b3"] = bias(n_hid)
    # Output Linear: xavier_normal(gain=relu), zero bias — as in __init__.
    raw["w4"] = lin(n_hid, n_classes, np.sqrt(2.0) * np.sqrt(2.0 / (n_hid + n_classes)))
    raw["b4"] = jnp.zeros((1, n_classes), jnp.float32)
    return raw


if __name__ == "__main__":
    # Small shapes consistent with the module.  n_feat is deliberately not a
    # multiple of 128 (exercises the unpadded full-extent F block); n_classes
    # is tiny and padded to 128 for lane-dense output stores.
    N, n_feat, n_hid, n_classes = 256, 96, 128, 10
    alpha = 0.1

    key = jax.random.PRNGKey(0)
    kx0, kx1, kp = jax.random.split(key, 3)
    x0_f32 = jax.random.normal(kx0, (N, n_feat), jnp.float32)
    x1_f32 = jax.random.normal(kx1, (N, n_feat), jnp.float32)

    coffs = jnp.array([1.0 - alpha, alpha], jnp.float32)
    raw = init_raw_params(kp, n_feat, n_hid, n_classes)
    params, n_cls = prepare_params(raw, coffs)
    x0, x1 = prepare_inputs(x0_f32, x1_f32)     # bf16, done once at data-prep time

    out = mgcmlp_forward(x0, x1, params, n_classes=n_cls)
    out = jax.block_until_ready(out)

    # Tight check vs. a reference with identical (folded, bf16-operand,
    # bf16-output) math; tolerance covers one-ulp bf16 rounding divergence.
    ref_b = ref_forward_prepared(x0, x1, params, n_cls)
    np.testing.assert_allclose(np.asarray(out.astype(jnp.float32)),
                               np.asarray(ref_b.astype(jnp.float32)),
                               rtol=1e-2, atol=1e-2)

    # Looser check vs. the exact f32 PyTorch eval-mode math (bf16 MXU operands
    # and bf16 output introduce sub-percent relative error).
    ref_f = ref_forward_f32(x0_f32, x1_f32, raw, coffs)
    np.testing.assert_allclose(np.asarray(out.astype(jnp.float32)),
                               np.asarray(ref_f), rtol=5e-2, atol=1.5e-1)

    print("KERNEL_OK")
</pallas_src>

<mosaic_0001>
module attributes {stable_mosaic.version = 11 : i64} {
  func.func @mgcmlp_kernel(%arg0: i32, %arg1: memref<256x96xbf16, #tpu.memory_space<vmem>>, %arg2: memref<256x96xbf16, #tpu.memory_space<vmem>>, %arg3: memref<96x128xbf16, #tpu.memory_space<vmem>>, %arg4: memref<1x128xf32, #tpu.memory_space<vmem>>, %arg5: memref<128x128xbf16, #tpu.memory_space<vmem>>, %arg6: memref<1x128xf32, #tpu.memory_space<vmem>>, %arg7: memref<96x128xbf16, #tpu.memory_space<vmem>>, %arg8: memref<1x128xf32, #tpu.memory_space<vmem>>, %arg9: memref<128x128xbf16, #tpu.memory_space<vmem>>, %arg10: memref<1x128xf32, #tpu.memory_space<vmem>>, %arg11: memref<128x128xbf16, #tpu.memory_space<vmem>>, %arg12: memref<1x128xf32, #tpu.memory_space<vmem>>, %arg13: memref<128x128xbf16, #tpu.memory_space<vmem>>, %arg14: memref<1x128xf32, #tpu.memory_space<vmem>>, %arg15: memref<256x128xbf16, #tpu.memory_space<vmem>>) attributes {dimension_semantics = [#tpu.dimension_semantics<parallel>], iteration_bounds = array<i64: 1>, scalar_prefetch = 0 : i64, scratch_operands = 0 : i64, tpu.core_type = #tpu.core_type<tc>, window_params = [{transform_indices = @transform_0, window_bounds = array<i64: 256, 96>}, {transform_indices = @transform_1, window_bounds = array<i64: 256, 96>}, {pipeline_mode = #tpu.pipeline_mode<synchronous>, transform_indices = @transform_2, window_bounds = array<i64: 96, 128>}, {pipeline_mode = #tpu.pipeline_mode<synchronous>, transform_indices = @transform_3, window_bounds = array<i64: 1, 128>}, {pipeline_mode = #tpu.pipeline_mode<synchronous>, transform_indices = @transform_4, window_bounds = array<i64: 128, 128>}, {pipeline_mode = #tpu.pipeline_mode<synchronous>, transform_indices = @transform_5, window_bounds = array<i64: 1, 128>}, {pipeline_mode = #tpu.pipeline_mode<synchronous>, transform_indices = @transform_6, window_bounds = array<i64: 96, 128>}, {pipeline_mode = #tpu.pipeline_mode<synchronous>, transform_indices = @transform_7, window_bounds = array<i64: 1, 128>}, {pipeline_mode = #tpu.pipeline_mode<synchronous>, transform_indices = @transform_8, window_bounds = array<i64: 128, 128>}, {pipeline_mode = #tpu.pipeline_mode<synchronous>, transform_indices = @transform_9, window_bounds = array<i64: 1, 128>}, {pipeline_mode = #tpu.pipeline_mode<synchronous>, transform_indices = @transform_10, window_bounds = array<i64: 128, 128>}, {pipeline_mode = #tpu.pipeline_mode<synchronous>, transform_indices = @transform_11, window_bounds = array<i64: 1, 128>}, {pipeline_mode = #tpu.pipeline_mode<synchronous>, transform_indices = @transform_12, window_bounds = array<i64: 128, 128>}, {pipeline_mode = #tpu.pipeline_mode<synchronous>, transform_indices = @transform_13, window_bounds = array<i64: 1, 128>}, {transform_indices = @transform_14, window_bounds = array<i64: 256, 128>}]} {
    %c0 = arith.constant 0 : index
    %c0_0 = arith.constant 0 : index
    %0 = vector.load %arg1[%c0, %c0_0] : memref<256x96xbf16, #tpu.memory_space<vmem>>, vector<256x96xbf16>
    %c0_1 = arith.constant 0 : index
    %c0_2 = arith.constant 0 : index
    %1 = vector.load %arg3[%c0_1, %c0_2] : memref<96x128xbf16, #tpu.memory_space<vmem>>, vector<96x128xbf16>
    %cst = arith.constant dense<0.000000e+00> : vector<256x128xf32>
    %2 = tpu.matmul %0, %1, %cst {dimension_numbers = #tpu.dot_dimension_numbers<[1], [0], [0], [1], [0, 0, 1, 1], [], []>} : vector<256x96xbf16>, vector<96x128xbf16>, vector<256x128xf32> -> vector<256x128xf32>
    %c0_3 = arith.constant 0 : index
    %c0_4 = arith.constant 0 : index
    %3 = vector.load %arg4[%c0_3, %c0_4] : memref<1x128xf32, #tpu.memory_space<vmem>>, vector<1x128xf32>
    %4 = vector.broadcast %3 : vector<1x128xf32> to vector<256x128xf32>
    %5 = arith.addf %2, %4 : vector<256x128xf32>
    %cst_5 = arith.constant 0.000000e+00 : f32
    %6 = vector.broadcast %cst_5 : f32 to vector<256x128xf32>
    %7 = arith.maximumf %5, %6 : vector<256x128xf32>
    %8 = arith.truncf %7 : vector<256x128xf32> to vector<256x128xbf16>
    %c0_6 = arith.constant 0 : index
    %c0_7 = arith.constant 0 : index
    %9 = vector.load %arg5[%c0_6, %c0_7] : memref<128x128xbf16, #tpu.memory_space<vmem>>, vector<128x128xbf16>
    %cst_8 = arith.constant dense<0.000000e+00> : vector<256x128xf32>
    %10 = tpu.matmul %8, %9, %cst_8 {dimension_numbers = #tpu.dot_dimension_numbers<[1], [0], [0], [1], [0, 0, 1, 1], [], []>} : vector<256x128xbf16>, vector<128x128xbf16>, vector<256x128xf32> -> vector<256x128xf32>
    %c0_9 = arith.constant 0 : index
    %c0_10 = arith.constant 0 : index
    %11 = vector.load %arg6[%c0_9, %c0_10] : memref<1x128xf32, #tpu.memory_space<vmem>>, vector<1x128xf32>
    %12 = vector.broadcast %11 : vector<1x128xf32> to vector<256x128xf32>
    %13 = arith.addf %10, %12 : vector<256x128xf32>
    %cst_11 = arith.constant 0.000000e+00 : f32
    %14 = vector.broadcast %cst_11 : f32 to vector<256x128xf32>
    %15 = arith.maximumf %13, %14 : vector<256x128xf32>
    %c0_12 = arith.constant 0 : index
    %c0_13 = arith.constant 0 : index
    %16 = vector.load %arg2[%c0_12, %c0_13] : memref<256x96xbf16, #tpu.memory_space<vmem>>, vector<256x96xbf16>
    %c0_14 = arith.constant 0 : index
    %c0_15 = arith.constant 0 : index
    %17 = vector.load %arg7[%c0_14, %c0_15] : memref<96x128xbf16, #tpu.memory_space<vmem>>, vector<96x128xbf16>
    %cst_16 = arith.constant dense<0.000000e+00> : vector<256x128xf32>
    %18 = tpu.matmul %16, %17, %cst_16 {dimension_numbers = #tpu.dot_dimension_numbers<[1], [0], [0], [1], [0, 0, 1, 1], [], []>} : vector<256x96xbf16>, vector<96x128xbf16>, vector<256x128xf32> -> vector<256x128xf32>
    %c0_17 = arith.constant 0 : index
    %c0_18 = arith.constant 0 : index
    %19 = vector.load %arg8[%c0_17, %c0_18] : memref<1x128xf32, #tpu.memory_space<vmem>>, vector<1x128xf32>
    %20 = vector.broadcast %19 : vector<1x128xf32> to vector<256x128xf32>
    %21 = arith.addf %18, %20 : vector<256x128xf32>
    %cst_19 = arith.constant 0.000000e+00 : f32
    %22 = vector.broadcast %cst_19 : f32 to vector<256x128xf32>
    %23 = arith.maximumf %21, %22 : vector<256x128xf32>
    %24 = arith.truncf %23 : vector<256x128xf32> to vector<256x128xbf16>
    %c0_20 = arith.constant 0 : index
    %c0_21 = arith.constant 0 : index
    %25 = vector.load %arg9[%c0_20, %c0_21] : memref<128x128xbf16, #tpu.memory_space<vmem>>, vector<128x128xbf16>
    %cst_22 = arith.constant dense<0.000000e+00> : vector<256x128xf32>
    %26 = tpu.matmul %24, %25, %cst_22 {dimension_numbers = #tpu.dot_dimension_numbers<[1], [0], [0], [1], [0, 0, 1, 1], [], []>} : vector<256x128xbf16>, vector<128x128xbf16>, vector<256x128xf32> -> vector<256x128xf32>
    %c0_23 = arith.constant 0 : index
    %c0_24 = arith.constant 0 : index
    %27 = vector.load %arg10[%c0_23, %c0_24] : memref<1x128xf32, #tpu.memory_space<vmem>>, vector<1x128xf32>
    %28 = vector.broadcast %27 : vector<1x128xf32> to vector<256x128xf32>
    %29 = arith.addf %26, %28 : vector<256x128xf32>
    %cst_25 = arith.constant 0.000000e+00 : f32
    %30 = vector.broadcast %cst_25 : f32 to vector<256x128xf32>
    %31 = arith.maximumf %29, %30 : vector<256x128xf32>
    %32 = arith.addf %15, %31 : vector<256x128xf32>
    %33 = arith.truncf %32 : vector<256x128xf32> to vector<256x128xbf16>
    %c0_26 = arith.constant 0 : index
    %c0_27 = arith.constant 0 : index
    %34 = vector.load %arg11[%c0_26, %c0_27] : memref<128x128xbf16, #tpu.memory_space<vmem>>, vector<128x128xbf16>
    %cst_28 = arith.constant dense<0.000000e+00> : vector<256x128xf32>
    %35 = tpu.matmul %33, %34, %cst_28 {dimension_numbers = #tpu.dot_dimension_numbers<[1], [0], [0], [1], [0, 0, 1, 1], [], []>} : vector<256x128xbf16>, vector<128x128xbf16>, vector<256x128xf32> -> vector<256x128xf32>
    %c0_29 = arith.constant 0 : index
    %c0_30 = arith.constant 0 : index
    %36 = vector.load %arg12[%c0_29, %c0_30] : memref<1x128xf32, #tpu.memory_space<vmem>>, vector<1x128xf32>
    %37 = vector.broadcast %36 : vector<1x128xf32> to vector<256x128xf32>
    %38 = arith.addf %35, %37 : vector<256x128xf32>
    %cst_31 = arith.constant 0.000000e+00 : f32
    %39 = vector.broadcast %cst_31 : f32 to vector<256x128xf32>
    %40 = arith.maximumf %38, %39 : vector<256x128xf32>
    %41 = arith.truncf %40 : vector<256x128xf32> to vector<256x128xbf16>
    %c0_32 = arith.constant 0 : index
    %c0_33 = arith.constant 0 : index
    %42 = vector.load %arg13[%c0_32, %c0_33] : memref<128x128xbf16, #tpu.memory_space<vmem>>, vector<128x128xbf16>
    %cst_34 = arith.constant dense<0.000000e+00> : vector<256x128xf32>
    %43 = tpu.matmul %41, %42, %cst_34 {dimension_numbers = #tpu.dot_dimension_numbers<[1], [0], [0], [1], [0, 0, 1, 1], [], []>} : vector<256x128xbf16>, vector<128x128xbf16>, vector<256x128xf32> -> vector<256x128xf32>
    %c0_35 = arith.constant 0 : index
    %c0_36 = arith.constant 0 : index
    %44 = vector.load %arg14[%c0_35, %c0_36] : memref<1x128xf32, #tpu.memory_space<vmem>>, vector<1x128xf32>
    %45 = vector.broadcast %44 : vector<1x128xf32> to vector<256x128xf32>
    %46 = arith.addf %43, %45 : vector<256x128xf32>
    %47 = arith.truncf %46 : vector<256x128xf32> to vector<256x128xbf16>
    %c0_37 = arith.constant 0 : index
    %c0_38 = arith.constant 0 : index
    %48 = vector.load %arg15[%c0_37, %c0_38] : memref<256x128xbf16, #tpu.memory_space<vmem>>, vector<256x128xbf16>
    tpu.vector_store %arg15[%c0_37, %c0_38], %47 {strides = array<i32>} : memref<256x128xbf16, #tpu.memory_space<vmem>>, vector<256x128xbf16>,
    return
  }
  func.func @transform_0(%arg0: i32) -> (i32, i32) {
    %c0_i32 = arith.constant 0 : i32
    %c0_i32_0 = arith.constant 0 : i32
    return %arg0, %c0_i32 : i32, i32
  }
  func.func @transform_1(%arg0: i32) -> (i32, i32) {
    %c0_i32 = arith.constant 0 : i32
    %c0_i32_0 = arith.constant 0 : i32
    return %arg0, %c0_i32 : i32, i32
  }
  func.func @transform_2(%arg0: i32) -> (i32, i32) {
    %c0_i32 = arith.constant 0 : i32
    %c0_i32_0 = arith.constant 0 : i32
    %c0_i32_1 = arith.constant 0 : i32
    return %c0_i32, %c0_i32_0 : i32, i32
  }
  func.func @transform_3(%arg0: i32) -> (i32, i32) {
    %c0_i32 = arith.constant 0 : i32
    %c0_i32_0 = arith.constant 0 : i32
    %c0_i32_1 = arith.constant 0 : i32
    return %c0_i32, %c0_i32_0 : i32, i32
  }
  func.func @transform_4(%arg0: i32) -> (i32, i32) {
    %c0_i32 = arith.constant 0 : i32
    %c0_i32_0 = arith.constant 0 : i32
    %c0_i32_1 = arith.constant 0 : i32
    return %c0_i32, %c0_i32_0 : i32, i32
  }
  func.func @transform_5(%arg0: i32) -> (i32, i32) {
    %c0_i32 = arith.constant 0 : i32
    %c0_i32_0 = arith.constant 0 : i32
    %c0_i32_1 = arith.constant 0 : i32
    return %c0_i32, %c0_i32_0 : i32, i32
  }
  func.func @transform_6(%arg0: i32) -> (i32, i32) {
    %c0_i32 = arith.constant 0 : i32
    %c0_i32_0 = arith.constant 0 : i32
    %c0_i32_1 = arith.constant 0 : i32
    return %c0_i32, %c0_i32_0 : i32, i32
  }
  func.func @transform_7(%arg0: i32) -> (i32, i32) {
    %c0_i32 = arith.constant 0 : i32
    %c0_i32_0 = arith.constant 0 : i32
    %c0_i32_1 = arith.constant 0 : i32
    return %c0_i32, %c0_i32_0 : i32, i32
  }
  func.func @transform_8(%arg0: i32) -> (i32, i32) {
    %c0_i32 = arith.constant 0 : i32
    %c0_i32_0 = arith.constant 0 : i32
    %c0_i32_1 = arith.constant 0 : i32
    return %c0_i32, %c0_i32_0 : i32, i32
  }
  func.func @transform_9(%arg0: i32) -> (i32, i32) {
    %c0_i32 = arith.constant 0 : i32
    %c0_i32_0 = arith.constant 0 : i32
    %c0_i32_1 = arith.constant 0 : i32
    return %c0_i32, %c0_i32_0 : i32, i32
  }
  func.func @transform_10(%arg0: i32) -> (i32, i32) {
    %c0_i32 = arith.constant 0 : i32
    %c0_i32_0 = arith.constant 0 : i32
    %c0_i32_1 = arith.constant 0 : i32
    return %c0_i32, %c0_i32_0 : i32, i32
  }
  func.func @transform_11(%arg0: i32) -> (i32, i32) {
    %c0_i32 = arith.constant 0 : i32
    %c0_i32_0 = arith.constant 0 : i32
    %c0_i32_1 = arith.constant 0 : i32
    return %c0_i32, %c0_i32_0 : i32, i32
  }
  func.func @transform_12(%arg0: i32) -> (i32, i32) {
    %c0_i32 = arith.constant 0 : i32
    %c0_i32_0 = arith.constant 0 : i32
    %c0_i32_1 = arith.constant 0 : i32
    return %c0_i32, %c0_i32_0 : i32, i32
  }
  func.func @transform_13(%arg0: i32) -> (i32, i32) {
    %c0_i32 = arith.constant 0 : i32
    %c0_i32_0 = arith.constant 0 : i32
    %c0_i32_1 = arith.constant 0 : i32
    return %c0_i32, %c0_i32_0 : i32, i32
  }
  func.func @transform_14(%arg0: i32) -> (i32, i32) {
    %c0_i32 = arith.constant 0 : i32
    %c0_i32_0 = arith.constant 0 : i32
    return %arg0, %c0_i32 : i32, i32
  }
}

</mosaic_0001>

<bundles_post_ra>
// kernel: mgcmlp_forward.1
= control target key start
LH: loop header
LB: loop body
LE: loop exit
PB: predicated region body
PF: predicated region fallthrough
CT: control target
= control target key end

     0   :  { %vm215_vm0 = vcmask 785408   ;;  %s3607_s2 = inlined_call_operand.vmem [shape: bf16[96,128], index: 2, kind: input, shape index: {}]   ;;  %s3608_s0 = inlined_call_operand.vmem [shape: bf16[256,96], index: 0, kind: input, shape index: {}]   ;;  %s3609_s6 = inlined_call_operand.vmem [shape: bf16[96,128], index: 6, kind: input, shape index: {}]   ;;  %s3610_s1 = inlined_call_operand.vmem [shape: bf16[256,96], index: 1, kind: input, shape index: {}]   ;;  %s3611_s4 = inlined_call_operand.vmem [shape: bf16[128,128], index: 4, kind: input, shape index: {}]   ;;  %s3612_s8 = inlined_call_operand.vmem [shape: bf16[128,128], index: 8, kind: input, shape index: {}]   ;;  %s3613_s3 = inlined_call_operand.vmem [shape: f32[1,128], index: 3, kind: input, shape index: {}]   ;;  %s3614_s7 = inlined_call_operand.vmem [shape: f32[1,128], index: 7, kind: input, shape index: {}]   ;;  %s3615_s10 = inlined_call_operand.vmem [shape: bf16[128,128], index: 10, kind: input, shape index: {}]   ;;  %s3616_s12 = inlined_call_operand.vmem [shape: bf16[128,128], index: 12, kind: input, shape index: {}]   ;;  %s3617_s5 = inlined_call_operand.vmem [shape: f32[1,128], index: 5, kind: input, shape index: {}]   ;;  %s3618_s9 = inlined_call_operand.vmem [shape: f32[1,128], index: 9, kind: input, shape index: {}]   ;;  %s3619_s11 = inlined_call_operand.vmem [shape: f32[1,128], index: 11, kind: input, shape index: {}]   ;;  %s3620_s13 = inlined_call_operand.vmem [shape: f32[1,128], index: 13, kind: input, shape index: {}]   ;;  %s3621_s14 = inlined_call_operand.vmem [shape: bf16[256,128], index: 14, kind: output, shape index: {}]  }
   0x1   :  { %v2842_v0 = vld [vmem:[%s3607_s2] sm:$0xff]   ;;  %v2843_v1 = vld [vmem:[%s3607_s2 + $0x8] sm:$0xff]   ;;  %v2844_v2 = vld [vmem:[%s3607_s2 + $0x10] sm:$0xff]  }
   0x2   :  { %2562 = vmatprep.subr.bf16.mxu0 %v2842_v0  ;;  %v2848_v3 = vld [vmem:[%s3608_s0] sm:$0xff]   ;;  %v2845_v4 = vld [vmem:[%s3607_s2 + $0x18] sm:$0xff]   ;;  %v2847_v6 = vld [vmem:[%s3607_s2 + $0x28] sm:$0xff]  }
   0x3   :  { %2563 = vmatpush3.bf16.msra.mxu0 %v2842_v0  ;;  %2574 = vmatprep.mubr.msk.bf16.mxu0 %vm215_vm0, %v2848_v3  ;;  %v2846_v5 = vld [vmem:[%s3607_s2 + $0x20] sm:$0xff]   ;;  %v2849_v8 = vld [vmem:[%s3608_s0 + $0x8] sm:$0xff]   ;;  %v2851_v9 = vld [vmem:[%s3608_s0 + $0x10] sm:$0xff]  }
   0x4   :  { %2564 = vmatprep.subr.bf16.mxu0 %v2843_v1  ;;  %v2850_v7 = vld [vmem:[%s3609_s6] sm:$0xff]   ;;  %v2853_v10 = vld [vmem:[%s3609_s6 + $0x8] sm:$0xff]   ;;  %v2856_v11 = vld [vmem:[%s3609_s6 + $0x10] sm:$0xff]  }
   0x5   :  { %v2852_v12 = vld [vmem:[%s3608_s0 + $0x18] sm:$0xff]   ;;  %v2854_v13 = vld [vmem:[%s3608_s0 + $0x20] sm:$0xff]   ;;  %v2855_v16 = vld [vmem:[%s3608_s0 + $0x28] sm:$0xff]  }
   0x6   :  { %v2861_v14 = vld [vmem:[%s3609_s6 + $0x18] sm:$0xff]   ;;  %v2864_v15 = vld [vmem:[%s3609_s6 + $0x20] sm:$0xff]   ;;  %v2857_v17 = vld [vmem:[%s3608_s0 + $0x30] sm:$0xff]  }
   0x7   :  { %2565 = vmatpush3.bf16.msra.mxu0 %v2843_v1  ;;  %v2867_v18 = vld [vmem:[%s3609_s6 + $0x28] sm:$0xff]   ;;  %v2886_v19 = vld [vmem:[%s3611_s4] sm:$0xff]   ;;  %v2858_v21 = vld [vmem:[%s3608_s0 + $0x38] sm:$0xff]  }
   0x8   :  { %2566 = vmatprep.subr.bf16.mxu0 %v2844_v2  ;;  %v2887_v20 = vld [vmem:[%s3611_s4 + $0x8] sm:$0xff]   ;;  %2606 = vmatprep.subr.bf16.mxu1 %v2886_v19  ;;  %v2859_v22 = vld [vmem:[%s3608_s0 + $0x40] sm:$0xff]   ;;  %v2888_v23 = vld [vmem:[%s3611_s4 + $0x10] sm:$0xff]  }
   0x9   :  { %2607 = vmatpush3.bf16.msra.mxu1 %v2886_v19  ;;  %v2889_v24 = vld [vmem:[%s3611_s4 + $0x18] sm:$0xff]   ;;  %v2860_v25 = vld [vmem:[%s3608_s0 + $0x48] sm:$0xff]   ;;  %v2862_v26 = vld [vmem:[%s3608_s0 + $0x50] sm:$0xff]  }
   0xa   :  { %2608 = vmatprep.subr.bf16.mxu1 %v2887_v20  ;;  %v2890_v27 = vld [vmem:[%s3611_s4 + $0x20] sm:$0xff]   ;;  %v2891_v28 = vld [vmem:[%s3611_s4 + $0x28] sm:$0xff]   ;;  %v2863_v29 = vld [vmem:[%s3608_s0 + $0x58] sm:$0xff]  }
   0xb   :  { %2567 = vmatpush3.bf16.msra.mxu0 %v2844_v2  ;;  %v2865_v30 = vld [vmem:[%s3608_s0 + $0x60] sm:$0xff]   ;;  %v2866_v31 = vld [vmem:[%s3608_s0 + $0x68] sm:$0xff]   ;;  %v2868_v32 = vld [vmem:[%s3608_s0 + $0x70] sm:$0xff]  }
   0xc   :  { %2568 = vmatprep.subr.bf16.mxu0 %v2845_v4  ;;  %v2869_v33 = vld [vmem:[%s3608_s0 + $0x78] sm:$0xff]   ;;  %v2870_v34 = vld [vmem:[%s3610_s1] sm:$0xff]   ;;  %v2871_v35 = vld [vmem:[%s3610_s1 + $0x8] sm:$0xff]  }
   0xd   :  { %2609 = vmatpush3.bf16.msra.mxu1 %v2887_v20  ;;  %v2872_v36 = vld [vmem:[%s3610_s1 + $0x10] sm:$0xff]   ;;  %v2873_v37 = vld [vmem:[%s3610_s1 + $0x18] sm:$0xff]   ;;  %v2874_v38 = vld [vmem:[%s3610_s1 + $0x20] sm:$0xff]  }
   0xe   :  { %2610 = vmatprep.subr.bf16.mxu1 %v2888_v23  ;;  %v2875_v39 = vld [vmem:[%s3610_s1 + $0x28] sm:$0xff]   ;;  %v2876_v40 = vld [vmem:[%s3610_s1 + $0x30] sm:$0xff]   ;;  %v2877_v41 = vld [vmem:[%s3610_s1 + $0x38] sm:$0xff]  }
   0xf   :  { %2569 = vmatpush3.bf16.msra.mxu0 %v2845_v4  ;;  %v2892_v42 = vld [vmem:[%s3611_s4 + $0x30] sm:$0xff]   ;;  %v2878_v43 = vld [vmem:[%s3610_s1 + $0x40] sm:$0xff]   ;;  %v2893_v44 = vld [vmem:[%s3611_s4 + $0x38] sm:$0xff]  }
  0x10   :  { %2570 = vmatprep.subr.bf16.mxu0 %v2846_v5  ;;  %v2879_v45 = vld [vmem:[%s3610_s1 + $0x48] sm:$0xff]   ;;  %v2880_v46 = vld [vmem:[%s3610_s1 + $0x50] sm:$0xff]   ;;  %v2881_v47 = vld [vmem:[%s3610_s1 + $0x58] sm:$0xff]  }
  0x11   :  { %2611 = vmatpush3.bf16.msra.mxu1 %v2888_v23  ;;  %v2882_v48 = vld [vmem:[%s3610_s1 + $0x60] sm:$0xff]   ;;  %v2883_v50 = vld [vmem:[%s3610_s1 + $0x68] sm:$0xff]   ;;  %v2884_v51 = vld [vmem:[%s3610_s1 + $0x70] sm:$0xff]  }
  0x12   :  { %2612 = vmatprep.subr.bf16.mxu1 %v2889_v24  ;;  %v2894_v49 = vld [vmem:[%s3612_s8] sm:$0xff]   ;;  %v2885_v52 = vld [vmem:[%s3610_s1 + $0x78] sm:$0xff]  }
  0x13   :  { %2571 = vmatpush3.bf16.msra.mxu0 %v2846_v5  ;;  %v3187_v53 = vld [vmem:[%s3613_s3] ss:$0 sm:$0xff]  ;;  %v2897_v23 = vld [vmem:[%s3612_s8 + $0x18] sm:$0xff]  }
  0x14   :  { %2572 = vmatprep.subr.bf16.mxu0 %v2847_v6 }
  0x15   :  { %2613 = vmatpush3.bf16.msra.mxu1 %v2889_v24 }
  0x16   :  { %2614 = vmatprep.subr.bf16.mxu1 %v2890_v27 }
  0x17   :  { %2573 = vmatpush3.bf16.msra.mxu0 %v2847_v6 }
  0x18   :  { %2654 = vmatprep.subr.bf16.mxu0 %v2850_v7 }
  0x19   :  { %2615 = vmatpush3.bf16.msra.mxu1 %v2890_v27 }
  0x1a   :  { %2575 = vmatmul.mubr.msk.bf16.vlgmr.msra.gmra.mrb[0].mxu0 %vm215_vm0, %v2849_v8  ;;  %2616 = vmatprep.subr.bf16.mxu1 %v2891_v28 }
  0x1b   :  { %2655 = vmatpush3.bf16.msra.mxu0 %v2850_v7  ;;  %2578 = vmatprep.mubr.msk.bf16.mxu0 %vm215_vm0, %v2851_v9  ;;  %v2895_v7 = vld [vmem:[%s3612_s8 + $0x8] sm:$0xff]  }
  0x1c   :  { %2656 = vmatprep.subr.bf16.mxu0 %v2853_v10 }
  0x1d   :  { %2617 = vmatpush3.bf16.msra.mxu1 %v2891_v28 }
  0x1e   :  { %2618 = vmatprep.subr.bf16.mxu1 %v2892_v42 }
  0x1f   :  { %2657 = vmatpush3.bf16.msra.mxu0 %v2853_v10 }
  0x20   :  { %2658 = vmatprep.subr.bf16.mxu0 %v2856_v11 }
  0x21   :  { %2619 = vmatpush3.bf16.msra.mxu1 %v2892_v42 }
  0x22   :  { %2579 = vmatmul.mubr.msk.bf16.gmra.mrb[4].mxu0 %vm215_vm0, %v2852_v12  ;;  %2620 = vmatprep.subr.bf16.mxu1 %v2893_v44 }
  0x23   :  { %2582 = vmatprep.mubr.msk.bf16.mxu0 %vm215_vm0, %v2854_v13  ;;  %2659 = vmatpush3.bf16.msra.mxu0 %v2856_v11 }
  0x24   :  { %2660 = vmatprep.subr.bf16.mxu0 %v2861_v14 }
  0x25   :  { %2621 = vmatpush3.bf16.msra.mxu1 %v2893_v44 }
  0x26   :  { %2698 = vmatprep.subr.bf16.mxu1 %v2894_v49 }
  0x27   :  { %2661 = vmatpush3.bf16.msra.mxu0 %v2861_v14 }
  0x28   :  { %2662 = vmatprep.subr.bf16.mxu0 %v2864_v15 }
  0x2a   :  { %2583 = vmatmul.mubr.msk.bf16.gmra.mrb[8].mxu0 %vm215_vm0, %v2855_v16 }
  0x2b   :  { %2586 = vmatprep.mubr.msk.bf16.mxu0 %vm215_vm0, %v2857_v17  ;;  %2663 = vmatpush3.bf16.msra.mxu0 %v2864_v15  ;;  %v2896_v15 = vld [vmem:[%s3612_s8 + $0x10] sm:$0xff]  }
  0x2c   :  { %2664 = vmatprep.subr.bf16.mxu0 %v2867_v18 }
  0x2f   :  { %2665 = vmatpush3.bf16.msra.mxu0 %v2867_v18 }
  0x32   :  { %2587 = vmatmul.mubr.msk.bf16.gmra.mrb[12].mxu0 %vm215_vm0, %v2858_v21 }
  0x33   :  { %2590 = vmatprep.mubr.msk.bf16.mxu0 %vm215_vm0, %v2859_v22 }
  0x3a   :  { %2591 = vmatmul.mubr.msk.bf16.gmra.mrb[16].mxu0 %vm215_vm0, %v2860_v25 }
  0x3b   :  { %2594 = vmatprep.mubr.msk.bf16.mxu0 %vm215_vm0, %v2862_v26 }
  0x42   :  { %2595 = vmatmul.mubr.msk.bf16.gmra.mrb[20].mxu0 %vm215_vm0, %v2863_v29 }
  0x43   :  { %2598 = vmatprep.mubr.msk.bf16.mxu0 %vm215_vm0, %v2865_v30 }
  0x4a   :  { %2599 = vmatmul.mubr.msk.bf16.gmra.mrb[24].mxu0 %vm215_vm0, %v2866_v31  ;;  %v2898_v31 = vld [vmem:[%s3612_s8 + $0x20] sm:$0xff]  }
  0x4b   :  { %2602 = vmatprep.mubr.msk.bf16.mxu0 %vm215_vm0, %v2868_v32 }
  0x52   :  { %2603 = vmatmul.mubr.msk.bf16.gmra.mrb[28].mxu0 %vm215_vm0, %v2869_v33 }
  0x53   :  { %2666 = vmatprep.mubr.msk.bf16.mxu0 %vm215_vm0, %v2870_v34 }
  0x5a   :  { %2667 = vmatmul.mubr.msk.bf16.vlgmr.msra.gmra.mrb[32].mxu0 %vm215_vm0, %v2871_v35 }
  0x5b   :  { %2670 = vmatprep.mubr.msk.bf16.mxu0 %vm215_vm0, %v2872_v36 }
  0x62   :  { %2671 = vmatmul.mubr.msk.bf16.gmra.mrb[36].mxu0 %vm215_vm0, %v2873_v37 }
  0x63   :  { %2674 = vmatprep.mubr.msk.bf16.mxu0 %vm215_vm0, %v2874_v38 }
  0x6a   :  { %2675 = vmatmul.mubr.msk.bf16.gmra.mrb[40].mxu0 %vm215_vm0, %v2875_v39  ;;  %v2899_v39 = vld [vmem:[%s3612_s8 + $0x28] sm:$0xff]  }
  0x6b   :  { %2678 = vmatprep.mubr.msk.bf16.mxu0 %vm215_vm0, %v2876_v40 }
  0x72   :  { %2679 = vmatmul.mubr.msk.bf16.gmra.mrb[44].mxu0 %vm215_vm0, %v2877_v41 }
  0x73   :  { %2682 = vmatprep.mubr.msk.bf16.mxu0 %vm215_vm0, %v2878_v43 }
  0x7a   :  { %2683 = vmatmul.mubr.msk.bf16.gmra.mrb[48].mxu0 %vm215_vm0, %v2879_v45 }
  0x7b   :  { %2686 = vmatprep.mubr.msk.bf16.mxu0 %vm215_vm0, %v2880_v46 }
  0x82   :  { %2687 = vmatmul.mubr.msk.bf16.gmra.mrb[52].mxu0 %vm215_vm0, %v2881_v47  ;;  %v2900_v47 = vld [vmem:[%s3612_s8 + $0x30] sm:$0xff]  }
  0x83   :  { %2690 = vmatprep.mubr.msk.bf16.mxu0 %vm215_vm0, %v2882_v48 }
  0x8a   :  { %2691 = vmatmul.mubr.msk.bf16.gmra.mrb[56].mxu0 %vm215_vm0, %v2883_v50 }
  0x8b   :  { %2694 = vmatprep.mubr.msk.bf16.mxu0 %vm215_vm0, %v2884_v51 }
  0x92   :  { %2695 = vmatmul.mubr.msk.bf16.gmra.mrb[60].mxu0 %vm215_vm0, %v2885_v52 }
  0xed   :  { %v2576_v54 = vpop.f32.mrb[0].mxu0 }
  0xee   :  { %v307_v55 = vadd.f32 %v2576_v54, %v3187_v53  ;;  %v298_v56 = vpop.f32.mrb[1].mxu0 }
  0xef   :  { %v299_v57 = vadd.f32 %v3187_v53, %v298_v56  ;;  %v2577_v58 = vpop.f32.mrb[2].mxu0  ;;  %v2901_v56 = vld [vmem:[%s3612_s8 + $0x38] sm:$0xff]  }
  0xf0   :  { %v310_v59 = vadd.f32 %v2577_v58, %v3187_v53  ;;  %v301_v60 = vpop.f32.mrb[3].mxu0  ;;  %v427_v62 = vmax.f32 %v307_v55, 0.0 }
  0xf1   :  { %v302_v61 = vadd.f32 %v3187_v53, %v301_v60  ;;  %v425_v0 = vmax.f32 %v299_v57, 0.0 }
  0xf2   :  { %v428_v63 = vmax.f32 %v310_v59, 0.0 }
  0xf3   :  { %v426_v1 = vmax.f32 %v302_v61, 0.0 }
  0xf4   :  { %v458_v2 = vpack.c.bf16 %v428_v63, %v427_v62 }
  0xf5   :  { %v2580_v3 = vpop.f32.mrb[4].mxu0  ;;  %v457_v4 = vpack.c.bf16 %v426_v1, %v425_v0 }
  0xf6   :  { %v323_v5 = vadd.f32 %v2580_v3, %v3187_v53  ;;  %v314_v6 = vpop.f32.mrb[5].mxu0 }
  0xf7   :  { %v315_v8 = vadd.f32 %v3187_v53, %v314_v6  ;;  %v2581_v9 = vpop.f32.mrb[6].mxu0  ;;  %2622 = vmatprep.mubr.bf16.mxu1 %v457_v4 }
  0xf8   :  { %v326_v10 = vadd.f32 %v2581_v9, %v3187_v53  ;;  %v317_v11 = vpop.f32.mrb[7].mxu0  ;;  %2623 = vmatmul.mubr.bf16.vlgmr.msra.gmra.mrb[0].mxu1 %v458_v2  ;;  %v431_v13 = vmax.f32 %v323_v5, 0.0 }
  0xf9   :  { %v318_v12 = vadd.f32 %v3187_v53, %v317_v11  ;;  %2699 = vmatpush3.bf16.msra.mxu1 %v2894_v49  ;;  %v429_v16 = vmax.f32 %v315_v8, 0.0 }
  0xfa   :  { %v432_v14 = vmax.f32 %v326_v10, 0.0  ;;  %2700 = vmatprep.subr.bf16.mxu1 %v2895_v7 }
  0xfb   :  { %v430_v17 = vmax.f32 %v318_v12, 0.0 }
  0xfc   :  { %v460_v18 = vpack.c.bf16 %v432_v14, %v431_v13 }
  0xfd   :  { %v459_v19 = vpack.c.bf16 %v430_v17, %v429_v16  ;;  %v2584_v20 = vpop.f32.mrb[8].mxu0  ;;  %2701 = vmatpush3.bf16.msra.mxu1 %v2895_v7 }
  0xfe   :  { %v339_v21 = vadd.f32 %v2584_v20, %v3187_v53  ;;  %v330_v22 = vpop.f32.mrb[9].mxu0  ;;  %2702 = vmatprep.subr.bf16.mxu1 %v2896_v15 }
  0xff   :  { %v331_v24 = vadd.f32 %v3187_v53, %v330_v22  ;;  %v2585_v25 = vpop.f32.mrb[10].mxu0  ;;  %2626 = vmatprep.mubr.bf16.mxu1 %v459_v19 }
 0x100   :  { %v342_v26 = vadd.f32 %v2585_v25, %v3187_v53  ;;  %v333_v27 = vpop.f32.mrb[11].mxu0  ;;  %2627 = vmatmul.mubr.bf16.gmra.mrb[4].mxu1 %v460_v18  ;;  %v435_v29 = vmax.f32 %v339_v21, 0.0 }
 0x101   :  { %v334_v28 = vadd.f32 %v3187_v53, %v333_v27  ;;  %2703 = vmatpush3.bf16.msra.mxu1 %v2896_v15  ;;  %v433_v32 = vmax.f32 %v331_v24, 0.0 }
 0x102   :  { %v436_v30 = vmax.f32 %v342_v26, 0.0  ;;  %2704 = vmatprep.subr.bf16.mxu1 %v2897_v23 }
 0x103   :  { %v434_v33 = vmax.f32 %v334_v28, 0.0 }
 0x104   :  { %v462_v34 = vpack.c.bf16 %v436_v30, %v435_v29 }
 0x105   :  { %v461_v35 = vpack.c.bf16 %v434_v33, %v433_v32  ;;  %v2588_v36 = vpop.f32.mrb[12].mxu0  ;;  %2705 = vmatpush3.bf16.msra.mxu1 %v2897_v23 }
 0x106   :  { %v355_v37 = vadd.f32 %v2588_v36, %v3187_v53  ;;  %v346_v38 = vpop.f32.mrb[13].mxu0  ;;  %2706 = vmatprep.subr.bf16.mxu1 %v2898_v31 }
 0x107   :  { %v347_v40 = vadd.f32 %v3187_v53, %v346_v38  ;;  %v2589_v41 = vpop.f32.mrb[14].mxu0  ;;  %2630 = vmatprep.mubr.bf16.mxu1 %v461_v35 }
 0x108   :  { %v358_v42 = vadd.f32 %v2589_v41, %v3187_v53  ;;  %v349_v43 = vpop.f32.mrb[15].mxu0  ;;  %2631 = vmatmul.mubr.bf16.gmra.mrb[8].mxu1 %v462_v34  ;;  %v439_v45 = vmax.f32 %v355_v37, 0.0 }
 0x109   :  { %v350_v44 = vadd.f32 %v3187_v53, %v349_v43  ;;  %2707 = vmatpush3.bf16.msra.mxu1 %v2898_v31  ;;  %v437_v48 = vmax.f32 %v347_v40, 0.0 }
 0x10a   :  { %v440_v46 = vmax.f32 %v358_v42, 0.0  ;;  %2708 = vmatprep.subr.bf16.mxu1 %v2899_v39 }
 0x10b   :  { %v438_v49 = vmax.f32 %v350_v44, 0.0  ;;  %v3245_v44 = vld [vmem:[%s3614_s7] ss:$0 sm:$0xff] }
 0x10c   :  { %v464_v50 = vpack.c.bf16 %v440_v46, %v439_v45 }
 0x10d   :  { %v463_v51 = vpack.c.bf16 %v438_v49, %v437_v48  ;;  %v2592_v52 = vpop.f32.mrb[16].mxu0  ;;  %2709 = vmatpush3.bf16.msra.mxu1 %v2899_v39 }
 0x10e   :  { %v371_v54 = vadd.f32 %v2592_v52, %v3187_v53  ;;  %v362_v55 = vpop.f32.mrb[17].mxu0  ;;  %2710 = vmatprep.subr.bf16.mxu1 %v2900_v47 }
 0x10f   :  { %v363_v57 = vadd.f32 %v3187_v53, %v362_v55  ;;  %v2593_v58 = vpop.f32.mrb[18].mxu0  ;;  %2634 = vmatprep.mubr.bf16.mxu1 %v463_v51 }
 0x110   :  { %v374_v59 = vadd.f32 %v2593_v58, %v3187_v53  ;;  %v365_v60 = vpop.f32.mrb[19].mxu0  ;;  %2635 = vmatmul.mubr.bf16.gmra.mrb[12].mxu1 %v464_v50  ;;  %v443_v62 = vmax.f32 %v371_v54, 0.0 }
 0x111   :  { %v366_v61 = vadd.f32 %v3187_v53, %v365_v60  ;;  %2711 = vmatpush3.bf16.msra.mxu1 %v2900_v47  ;;  %v441_v0 = vmax.f32 %v363_v57, 0.0 }
 0x112   :  { %v444_v63 = vmax.f32 %v374_v59, 0.0  ;;  %2712 = vmatprep.subr.bf16.mxu1 %v2901_v56 }
 0x113   :  { %v442_v1 = vmax.f32 %v366_v61, 0.0 }
 0x114   :  { %v466_v2 = vpack.c.bf16 %v444_v63, %v443_v62 }
 0x115   :  { %v465_v3 = vpack.c.bf16 %v442_v1, %v441_v0  ;;  %v2596_v4 = vpop.f32.mrb[20].mxu0  ;;  %2713 = vmatpush3.bf16.msra.mxu1 %v2901_v56 }
 0x116   :  { %v387_v5 = vadd.f32 %v2596_v4, %v3187_v53  ;;  %v378_v6 = vpop.f32.mrb[21].mxu0 }
 0x117   :  { %v379_v7 = vadd.f32 %v3187_v53, %v378_v6  ;;  %v2597_v8 = vpop.f32.mrb[22].mxu0  ;;  %2638 = vmatprep.mubr.bf16.mxu1 %v465_v3 }
 0x118   :  { %v390_v9 = vadd.f32 %v2597_v8, %v3187_v53  ;;  %v381_v10 = vpop.f32.mrb[23].mxu0  ;;  %2639 = vmatmul.mubr.bf16.gmra.mrb[16].mxu1 %v466_v2  ;;  %v447_v12 = vmax.f32 %v387_v5, 0.0 }
 0x119   :  { %v382_v11 = vadd.f32 %v3187_v53, %v381_v10  ;;  %v445_v14 = vmax.f32 %v379_v7, 0.0 }
 0x11a   :  { %v448_v13 = vmax.f32 %v390_v9, 0.0 }
 0x11b   :  { %v446_v15 = vmax.f32 %v382_v11, 0.0 }
 0x11c   :  { %v468_v16 = vpack.c.bf16 %v448_v13, %v447_v12 }
 0x11d   :  { %v467_v17 = vpack.c.bf16 %v446_v15, %v445_v14  ;;  %v2600_v18 = vpop.f32.mrb[24].mxu0 }
 0x11e   :  { %v403_v19 = vadd.f32 %v2600_v18, %v3187_v53  ;;  %v394_v20 = vpop.f32.mrb[25].mxu0 }
 0x11f   :  { %v395_v21 = vadd.f32 %v3187_v53, %v394_v20  ;;  %v2601_v22 = vpop.f32.mrb[26].mxu0  ;;  %2642 = vmatprep.mubr.bf16.mxu1 %v467_v17 }
 0x120   :  { %v406_v23 = vadd.f32 %v2601_v22, %v3187_v53  ;;  %v397_v24 = vpop.f32.mrb[27].mxu0  ;;  %2643 = vmatmul.mubr.bf16.gmra.mrb[20].mxu1 %v468_v16  ;;  %v451_v26 = vmax.f32 %v403_v19, 0.0 }
 0x121   :  { %v398_v25 = vadd.f32 %v3187_v53, %v397_v24  ;;  %v449_v28 = vmax.f32 %v395_v21, 0.0 }
 0x122   :  { %v452_v27 = vmax.f32 %v406_v23, 0.0 }
 0x123   :  { %v450_v29 = vmax.f32 %v398_v25, 0.0 }
 0x124   :  { %v470_v30 = vpack.c.bf16 %v452_v27, %v451_v26 }
 0x125   :  { %v469_v31 = vpack.c.bf16 %v450_v29, %v449_v28  ;;  %v2604_v32 = vpop.f32.mrb[28].mxu0 }
 0x126   :  { %v419_v33 = vadd.f32 %v2604_v32, %v3187_v53  ;;  %v410_v34 = vpop.f32.mrb[29].mxu0 }
 0x127   :  { %v411_v35 = vadd.f32 %v3187_v53, %v410_v34  ;;  %v2605_v36 = vpop.f32.mrb[30].mxu0  ;;  %2646 = vmatprep.mubr.bf16.mxu1 %v469_v31 }
 0x128   :  { %v422_v37 = vadd.f32 %v2605_v36, %v3187_v53  ;;  %v413_v38 = vpop.f32.mrb[31].mxu0  ;;  %2647 = vmatmul.mubr.bf16.gmra.mrb[24].mxu1 %v470_v30  ;;  %v455_v40 = vmax.f32 %v419_v33, 0.0 }
 0x129   :  { %v414_v39 = vadd.f32 %v3187_v53, %v413_v38  ;;  %v453_v42 = vmax.f32 %v411_v35, 0.0 }
 0x12a   :  { %v456_v41 = vmax.f32 %v422_v37, 0.0 }
 0x12b   :  { %v454_v43 = vmax.f32 %v414_v39, 0.0 }
 0x12c   :  { %v472_v45 = vpack.c.bf16 %v456_v41, %v455_v40 }
 0x12d   :  { %v471_v46 = vpack.c.bf16 %v454_v43, %v453_v42  ;;  %v2668_v47 = vpop.f32.mrb[32].mxu0 }
 0x12e   :  { %v995_v48 = vadd.f32 %v2668_v47, %v3245_v44  ;;  %v986_v49 = vpop.f32.mrb[33].mxu0 }
 0x12f   :  { %v987_v50 = vadd.f32 %v3245_v44, %v986_v49  ;;  %2650 = vmatprep.mubr.bf16.mxu1 %v471_v46  ;;  %v2669_v51 = vpop.f32.mrb[34].mxu0 }
 0x130   :  { %v998_v53 = vadd.f32 %v2669_v51, %v3245_v44  ;;  %2651 = vmatmul.mubr.bf16.gmra.mrb[28].mxu1 %v472_v45  ;;  %v989_v52 = vpop.f32.mrb[35].mxu0  ;;  %v1115_v55 = vmax.f32 %v995_v48, 0.0 }
 0x131   :  { %v990_v54 = vadd.f32 %v3245_v44, %v989_v52  ;;  %v1113_v57 = vmax.f32 %v987_v50, 0.0 }
 0x132   :  { %v1116_v56 = vmax.f32 %v998_v53, 0.0 }
 0x133   :  { %v1114_v58 = vmax.f32 %v990_v54, 0.0 }
 0x134   :  { %v1146_v59 = vpack.c.bf16 %v1116_v56, %v1115_v55 }
 0x135   :  { %v1145_v60 = vpack.c.bf16 %v1114_v58, %v1113_v57  ;;  %v2672_v61 = vpop.f32.mrb[36].mxu0 }
 0x136   :  { %v1011_v62 = vadd.f32 %v2672_v61, %v3245_v44  ;;  %v1002_v63 = vpop.f32.mrb[37].mxu0 }
 0x137   :  { %v1003_v0 = vadd.f32 %v3245_v44, %v1002_v63  ;;  %v2673_v1 = vpop.f32.mrb[38].mxu0  ;;  %2714 = vmatprep.mubr.bf16.mxu1 %v1145_v60 }
 0x138   :  { %v1014_v2 = vadd.f32 %v2673_v1, %v3245_v44  ;;  %v1005_v3 = vpop.f32.mrb[39].mxu0  ;;  %2715 = vmatmul.mubr.bf16.vlgmr.msra.gmra.mrb[32].mxu1 %v1146_v59  ;;  %v1119_v5 = vmax.f32 %v1011_v62, 0.0 }
 0x139   :  { %v1006_v4 = vadd.f32 %v3245_v44, %v1005_v3  ;;  %v1117_v7 = vmax.f32 %v1003_v0, 0.0  ;;  %v2902_v0 = vld [vmem:[%s3615_s10] sm:$0xff]  }
 0x13a   :  { %v1120_v6 = vmax.f32 %v1014_v2, 0.0  ;;  %2746 = vmatprep.subr.bf16.mxu0 %v2902_v0 }
 0x13b   :  { %v1118_v8 = vmax.f32 %v1006_v4, 0.0  ;;  %2747 = vmatpush3.bf16.msra.mxu0 %v2902_v0 }
 0x13c   :  { %v1148_v9 = vpack.c.bf16 %v1120_v6, %v1119_v5 }
 0x13d   :  { %v1147_v10 = vpack.c.bf16 %v1118_v8, %v1117_v7  ;;  %v2676_v11 = vpop.f32.mrb[40].mxu0 }
 0x13e   :  { %v1027_v12 = vadd.f32 %v2676_v11, %v3245_v44  ;;  %v1018_v13 = vpop.f32.mrb[41].mxu0 }
 0x13f   :  { %v1019_v14 = vadd.f32 %v3245_v44, %v1018_v13  ;;  %v2677_v15 = vpop.f32.mrb[42].mxu0  ;;  %2718 = vmatprep.mubr.bf16.mxu1 %v1147_v10  ;;  %v2903_v13 = vld [vmem:[%s3615_s10 + $0x8] sm:$0xff]  }
 0x140   :  { %v1030_v16 = vadd.f32 %v2677_v15, %v3245_v44  ;;  %v1021_v17 = vpop.f32.mrb[43].mxu0  ;;  %2719 = vmatmul.mubr.bf16.gmra.mrb[36].mxu1 %v1148_v9  ;;  %v1123_v19 = vmax.f32 %v1027_v12, 0.0  ;;  %2748 = vmatprep.subr.bf16.mxu0 %v2903_v13 }
 0x141   :  { %v1022_v18 = vadd.f32 %v3245_v44, %v1021_v17  ;;  %v1121_v21 = vmax.f32 %v1019_v14, 0.0  ;;  %2749 = vmatpush3.bf16.msra.mxu0 %v2903_v13 }
 0x142   :  { %v1124_v20 = vmax.f32 %v1030_v16, 0.0 }
 0x143   :  { %v1122_v22 = vmax.f32 %v1022_v18, 0.0 }
 0x144   :  { %v1150_v23 = vpack.c.bf16 %v1124_v20, %v1123_v19 }
 0x145   :  { %v1149_v24 = vpack.c.bf16 %v1122_v22, %v1121_v21  ;;  %v2680_v25 = vpop.f32.mrb[44].mxu0 }
 0x146   :  { %v1043_v26 = vadd.f32 %v2680_v25, %v3245_v44  ;;  %v1034_v27 = vpop.f32.mrb[45].mxu0 }
 0x147   :  { %v1035_v28 = vadd.f32 %v3245_v44, %v1034_v27  ;;  %v2681_v29 = vpop.f32.mrb[46].mxu0  ;;  %2722 = vmatprep.mubr.bf16.mxu1 %v1149_v24 }
 0x148   :  { %v1046_v30 = vadd.f32 %v2681_v29, %v3245_v44  ;;  %v1037_v31 = vpop.f32.mrb[47].mxu0  ;;  %2723 = vmatmul.mubr.bf16.gmra.mrb[40].mxu1 %v1150_v23  ;;  %v1127_v33 = vmax.f32 %v1043_v26, 0.0 }
 0x149   :  { %v1038_v32 = vadd.f32 %v3245_v44, %v1037_v31  ;;  %v1125_v35 = vmax.f32 %v1035_v28, 0.0  ;;  %v2904_v28 = vld [vmem:[%s3615_s10 + $0x10] sm:$0xff]  }
 0x14a   :  { %v1128_v34 = vmax.f32 %v1046_v30, 0.0  ;;  %2750 = vmatprep.subr.bf16.mxu0 %v2904_v28 }
 0x14b   :  { %v1126_v36 = vmax.f32 %v1038_v32, 0.0  ;;  %2751 = vmatpush3.bf16.msra.mxu0 %v2904_v28 }
 0x14c   :  { %v1152_v37 = vpack.c.bf16 %v1128_v34, %v1127_v33 }
 0x14d   :  { %v1151_v38 = vpack.c.bf16 %v1126_v36, %v1125_v35  ;;  %v2684_v39 = vpop.f32.mrb[48].mxu0  ;;  %v2905_v35 = vld [vmem:[%s3615_s10 + $0x18] sm:$0xff]   ;;  %v2907_v36 = vld [vmem:[%s3615_s10 + $0x28] sm:$0xff]  }
 0x14e   :  { %v1059_v40 = vadd.f32 %v2684_v39, %v3245_v44  ;;  %v1050_v41 = vpop.f32.mrb[49].mxu0  ;;  %2752 = vmatprep.subr.bf16.mxu0 %v2905_v35 }
 0x14f   :  { %v1051_v42 = vadd.f32 %v3245_v44, %v1050_v41  ;;  %v2685_v43 = vpop.f32.mrb[50].mxu0  ;;  %2726 = vmatprep.mubr.bf16.mxu1 %v1151_v38  ;;  %2753 = vmatpush3.bf16.msra.mxu0 %v2905_v35  ;;  %v2909_v38 = vld [vmem:[%s3615_s10 + $0x38] sm:$0xff]  }
 0x150   :  { %v1062_v45 = vadd.f32 %v2685_v43, %v3245_v44  ;;  %v1053_v46 = vpop.f32.mrb[51].mxu0  ;;  %2727 = vmatmul.mubr.bf16.gmra.mrb[44].mxu1 %v1152_v37  ;;  %v1131_v48 = vmax.f32 %v1059_v40, 0.0  ;;  %v2908_v37 = vld [vmem:[%s3615_s10 + $0x30] sm:$0xff]   ;;  %v2910_v43 = vld [vmem:[%s3616_s12] sm:$0xff]  }
 0x151   :  { %v1054_v47 = vadd.f32 %v3245_v44, %v1053_v46  ;;  %v1129_v50 = vmax.f32 %v1051_v42, 0.0  ;;  %2794 = vmatprep.subr.bf16.mxu1 %v2910_v43 }
 0x152   :  { %v1132_v49 = vmax.f32 %v1062_v45, 0.0  ;;  %v2911_v45 = vld [vmem:[%s3616_s12 + $0x8] sm:$0xff]   ;;  %2795 = vmatpush3.bf16.msra.mxu1 %v2910_v43 }
 0x153   :  { %v1130_v51 = vmax.f32 %v1054_v47, 0.0  ;;  %2796 = vmatprep.subr.bf16.mxu1 %v2911_v45 }
 0x154   :  { %v1154_v53 = vpack.c.bf16 %v1132_v49, %v1131_v48  ;;  %v2912_v49 = vld [vmem:[%s3616_s12 + $0x10] sm:$0xff]  }
 0x155   :  { %v1153_v52 = vpack.c.bf16 %v1130_v51, %v1129_v50  ;;  %v2688_v54 = vpop.f32.mrb[52].mxu0  ;;  %v2913_v51 = vld [vmem:[%s3616_s12 + $0x18] sm:$0xff]  }
 0x156   :  { %v1075_v55 = vadd.f32 %v2688_v54, %v3245_v44  ;;  %v1066_v56 = vpop.f32.mrb[53].mxu0  ;;  %2797 = vmatpush3.bf16.msra.mxu1 %v2911_v45 }
 0x157   :  { %v1067_v57 = vadd.f32 %v3245_v44, %v1066_v56  ;;  %v2689_v58 = vpop.f32.mrb[54].mxu0  ;;  %2730 = vmatprep.mubr.bf16.mxu1 %v1153_v52  ;;  %2798 = vmatprep.subr.bf16.mxu1 %v2912_v49 }
 0x158   :  { %v1078_v59 = vadd.f32 %v2689_v58, %v3245_v44  ;;  %v1069_v60 = vpop.f32.mrb[55].mxu0  ;;  %2731 = vmatmul.mubr.bf16.gmra.mrb[48].mxu1 %v1154_v53  ;;  %v1135_v61 = vmax.f32 %v1075_v55, 0.0  ;;  %v2914_v55 = vld [vmem:[%s3616_s12 + $0x20] sm:$0xff]  }
 0x159   :  { %v1070_v62 = vadd.f32 %v3245_v44, %v1069_v60  ;;  %v1133_v1 = vmax.f32 %v1067_v57, 0.0  ;;  %v2915_v57 = vld [vmem:[%s3616_s12 + $0x28] sm:$0xff]  }
 0x15a   :  { %v1136_v63 = vmax.f32 %v1078_v59, 0.0  ;;  %2799 = vmatpush3.bf16.msra.mxu1 %v2912_v49 }
 0x15b   :  { %v1134_v2 = vmax.f32 %v1070_v62, 0.0  ;;  %2800 = vmatprep.subr.bf16.mxu1 %v2913_v51 }
 0x15c   :  { %v1156_v3 = vpack.c.bf16 %v1136_v63, %v1135_v61  ;;  %v2916_v61 = vld [vmem:[%s3616_s12 + $0x30] sm:$0xff]  }
 0x15d   :  { %v1155_v4 = vpack.c.bf16 %v1134_v2, %v1133_v1  ;;  %v2692_v5 = vpop.f32.mrb[56].mxu0 }
 0x15e   :  { %v1091_v6 = vadd.f32 %v2692_v5, %v3245_v44  ;;  %v1082_v7 = vpop.f32.mrb[57].mxu0  ;;  %2801 = vmatpush3.bf16.msra.mxu1 %v2913_v51 }
 0x15f   :  { %v1083_v8 = vadd.f32 %v3245_v44, %v1082_v7  ;;  %v2693_v9 = vpop.f32.mrb[58].mxu0  ;;  %2734 = vmatprep.mubr.bf16.mxu1 %v1155_v4  ;;  %2802 = vmatprep.subr.bf16.mxu1 %v2914_v55 }
 0x160   :  { %v1094_v10 = vadd.f32 %v2693_v9, %v3245_v44  ;;  %v1085_v11 = vpop.f32.mrb[59].mxu0  ;;  %2735 = vmatmul.mubr.bf16.gmra.mrb[52].mxu1 %v1156_v3  ;;  %v1139_v14 = vmax.f32 %v1091_v6, 0.0 }
 0x161   :  { %v1086_v12 = vadd.f32 %v3245_v44, %v1085_v11  ;;  %v1137_v16 = vmax.f32 %v1083_v8, 0.0 }
 0x162   :  { %v1140_v15 = vmax.f32 %v1094_v10, 0.0  ;;  %2803 = vmatpush3.bf16.msra.mxu1 %v2914_v55 }
 0x163   :  { %v1138_v17 = vmax.f32 %v1086_v12, 0.0  ;;  %2804 = vmatprep.subr.bf16.mxu1 %v2915_v57 }
 0x164   :  { %v1158_v18 = vpack.c.bf16 %v1140_v15, %v1139_v14  ;;  %v3383_v15 = vld [vmem:[%s3617_s5] ss:$0 sm:$0xff] }
 0x165   :  { %v1157_v19 = vpack.c.bf16 %v1138_v17, %v1137_v16  ;;  %v2696_v20 = vpop.f32.mrb[60].mxu0  ;;  %v3388_v16 = vld [vmem:[%s3618_s9] ss:$0 sm:$0xff] }
 0x166   :  { %v1107_v21 = vadd.f32 %v2696_v20, %v3245_v44  ;;  %v1098_v22 = vpop.f32.mrb[61].mxu0  ;;  %2805 = vmatpush3.bf16.msra.mxu1 %v2915_v57 }
 0x167   :  { %v1099_v23 = vadd.f32 %v3245_v44, %v1098_v22  ;;  %v2697_v24 = vpop.f32.mrb[62].mxu0  ;;  %2738 = vmatprep.mubr.bf16.mxu1 %v1157_v19  ;;  %2806 = vmatprep.subr.bf16.mxu1 %v2916_v61 }
 0x168   :  { %v1110_v25 = vadd.f32 %v2697_v24, %v3245_v44  ;;  %v1101_v26 = vpop.f32.mrb[63].mxu0  ;;  %2739 = vmatmul.mubr.bf16.gmra.mrb[56].mxu1 %v1158_v18  ;;  %v1143_v29 = vmax.f32 %v1107_v21, 0.0 }
 0x169   :  { %v1102_v27 = vadd.f32 %v3245_v44, %v1101_v26  ;;  %v1141_v31 = vmax.f32 %v1099_v23, 0.0  ;;  %v2906_v44 = vld [vmem:[%s3615_s10 + $0x20] sm:$0xff]  }
 0x16a   :  { %v1144_v30 = vmax.f32 %v1110_v25, 0.0  ;;  %2754 = vmatprep.subr.bf16.mxu0 %v2906_v44  ;;  %2807 = vmatpush3.bf16.msra.mxu1 %v2916_v61 }
 0x16b   :  { %v1142_v32 = vmax.f32 %v1102_v27, 0.0  ;;  %2755 = vmatpush3.bf16.msra.mxu0 %v2906_v44 }
 0x16c   :  { %v1160_v33 = vpack.c.bf16 %v1144_v30, %v1143_v29  ;;  %2756 = vmatprep.subr.bf16.mxu0 %v2907_v36 }
 0x16d   :  { %v1159_v34 = vpack.c.bf16 %v1142_v32, %v1141_v31 }
 0x16f   :  { %2742 = vmatprep.mubr.bf16.mxu1 %v1159_v34  ;;  %2757 = vmatpush3.bf16.msra.mxu0 %v2907_v36 }
 0x170   :  { %2743 = vmatmul.mubr.bf16.gmra.mrb[60].mxu1 %v1160_v33  ;;  %2758 = vmatprep.subr.bf16.mxu0 %v2908_v37 }
 0x173   :  { %2759 = vmatpush3.bf16.msra.mxu0 %v2908_v37 }
 0x174   :  { %2760 = vmatprep.subr.bf16.mxu0 %v2909_v38 }
 0x177   :  { %2761 = vmatpush3.bf16.msra.mxu0 %v2909_v38 }
 0x1cb   :  { %v2624_v39 = vpop.f32.mrb[0].mxu1 }
 0x1cc   :  { %v578_v40 = vpop.f32.mrb[1].mxu1  ;;  %v587_v17 = vadd.f32 %v2624_v39, %v3383_v15 }
 0x1cd   :  { %v2625_v41 = vpop.f32.mrb[2].mxu1  ;;  %v579_v18 = vadd.f32 %v3383_v15, %v578_v40 }
 0x1ce   :  { %v581_v42 = vpop.f32.mrb[3].mxu1  ;;  %v590_v20 = vadd.f32 %v2625_v41, %v3383_v15  ;;  %v707_v26 = vmax.f32 %v587_v17, 0.0 }
 0x1cf   :  { %v582_v23 = vadd.f32 %v3383_v15, %v581_v42  ;;  %v705_v30 = vmax.f32 %v579_v18, 0.0 }
 0x1d0   :  { %v708_v33 = vmax.f32 %v590_v20, 0.0 }
 0x1d1   :  { %v706_v44 = vmax.f32 %v582_v23, 0.0 }
 0x1d3   :  { %v3309_v46 = vpop.f32.mrb[4].mxu1 }
 0x1d4   :  { %v3311_v47 = vpop.f32.mrb[5].mxu1  ;;  %v603_v38 = vadd.f32 %v3309_v46, %v3383_v15 }
 0x1d5   :  { %v3313_v48 = vpop.f32.mrb[6].mxu1  ;;  %v595_v40 = vadd.f32 %v3383_v15, %v3311_v47 }
 0x1d6   :  { %v3318_v50 = vpop.f32.mrb[7].mxu1  ;;  %v606_v43 = vadd.f32 %v3313_v48, %v3383_v15  ;;  %v711_v17 = vmax.f32 %v603_v38, 0.0 }
 0x1d7   :  { %v598_v55 = vadd.f32 %v3383_v15, %v3318_v50  ;;  %v709_v20 = vmax.f32 %v595_v40, 0.0 }
 0x1db   :  { %v3323_v53 = vpop.f32.mrb[8].mxu1 }
 0x1dc   :  { %v3325_v52 = vpop.f32.mrb[9].mxu1 }
 0x1dd   :  { %v3327_v54 = vpop.f32.mrb[10].mxu1 }
 0x1de   :  { %v3332_v56 = vpop.f32.mrb[11].mxu1 }
 0x1e3   :  { %v3337_v58 = vpop.f32.mrb[12].mxu1 }
 0x1e4   :  { %v3339_v59 = vpop.f32.mrb[13].mxu1 }
 0x1e5   :  { %v3341_v60 = vpop.f32.mrb[14].mxu1 }
 0x1e6   :  { %v3346_v62 = vpop.f32.mrb[15].mxu1 }
 0x1eb   :  { %v3348_v63 = vpop.f32.mrb[16].mxu1 }
 0x1ec   :  { %v3350_v0 = vpop.f32.mrb[17].mxu1 }
 0x1ed   :  { %v3352_v1 = vpop.f32.mrb[18].mxu1 }
 0x1ee   :  { %v3354_v2 = vpop.f32.mrb[19].mxu1 }
 0x1f3   :  { %v3356_v3 = vpop.f32.mrb[20].mxu1 }
 0x1f4   :  { %v3358_v4 = vpop.f32.mrb[21].mxu1 }
 0x1f5   :  { %v3360_v5 = vpop.f32.mrb[22].mxu1 }
 0x1f6   :  { %v3362_v6 = vpop.f32.mrb[23].mxu1 }
 0x1fb   :  { %v3364_v7 = vpop.f32.mrb[24].mxu1 }
 0x1fc   :  { %v3366_v8 = vpop.f32.mrb[25].mxu1 }
 0x1fd   :  { %v3368_v9 = vpop.f32.mrb[26].mxu1 }
 0x1fe   :  { %v3370_v10 = vpop.f32.mrb[27].mxu1 }
 0x203   :  { %v3372_v11 = vpop.f32.mrb[28].mxu1 }
 0x204   :  { %v3374_v12 = vpop.f32.mrb[29].mxu1 }
 0x205   :  { %v3376_v13 = vpop.f32.mrb[30].mxu1 }
 0x206   :  { %v3378_v14 = vpop.f32.mrb[31].mxu1 }
 0x20b   :  { %v2716_v19 = vpop.f32.mrb[32].mxu1 }
 0x20c   :  { %v1275_v21 = vadd.f32 %v2716_v19, %v3388_v16  ;;  %v1266_v22 = vpop.f32.mrb[33].mxu1 }
 0x20d   :  { %v1267_v24 = vadd.f32 %v3388_v16, %v1266_v22  ;;  %v2717_v25 = vpop.f32.mrb[34].mxu1  ;;  %v712_v22 = vmax.f32 %v606_v43, 0.0 }
 0x20e   :  { %v1395_v27 = vmax.f32 %v1275_v21, 0.0  ;;  %v1278_v28 = vadd.f32 %v2717_v25, %v3388_v16  ;;  %v1269_v29 = vpop.f32.mrb[35].mxu1  ;;  %v710_v25 = vmax.f32 %v598_v55, 0.0 }
 0x20f   :  { %v1393_v31 = vmax.f32 %v1267_v24, 0.0  ;;  %v1270_v32 = vadd.f32 %v3388_v16, %v1269_v29  ;;  %v611_v29 = vadd.f32 %v3383_v15, %v3325_v52 }
 0x210   :  { %v1427_v34 = vadd.f32 %v1395_v27, %v707_v26  ;;  %v1396_v35 = vmax.f32 %v1278_v28, 0.0  ;;  %v619_v27 = vadd.f32 %v3323_v53, %v3383_v15 }
 0x211   :  { %v1425_v36 = vadd.f32 %v1393_v31, %v705_v30  ;;  %v1394_v37 = vmax.f32 %v1270_v32, 0.0  ;;  %v622_v32 = vadd.f32 %v3327_v54, %v3383_v15 }
 0x212   :  { %v1428_v39 = vadd.f32 %v1396_v35, %v708_v33  ;;  %v715_v38 = vmax.f32 %v619_v27, 0.0 }
 0x213   :  { %v1426_v41 = vadd.f32 %v1394_v37, %v706_v44  ;;  %v2720_v42 = vpop.f32.mrb[36].mxu1  ;;  %v614_v44 = vadd.f32 %v3383_v15, %v3332_v56  ;;  %v716_v43 = vmax.f32 %v622_v32, 0.0 }
 0x214   :  { %v1458_v45 = vpack.c.bf16 %v1428_v39, %v1427_v34  ;;  %v1291_v49 = vadd.f32 %v2720_v42, %v3388_v16  ;;  %v1282_v51 = vpop.f32.mrb[37].mxu1 }
 0x215   :  { %v1283_v57 = vadd.f32 %v3388_v16, %v1282_v51  ;;  %v2721_v61 = vpop.f32.mrb[38].mxu1  ;;  %v1457_v46 = vpack.c.bf16 %v1426_v41, %v1425_v36  ;;  %v713_v41 = vmax.f32 %v611_v29, 0.0  ;;  %v714_v51 = vmax.f32 %v614_v44, 0.0 }
 0x216   :  { %v1399_v18 = vmax.f32 %v1291_v49, 0.0  ;;  %v1294_v47 = vadd.f32 %v2721_v61, %v3388_v16  ;;  %v1285_v19 = vpop.f32.mrb[39].mxu1 }
 0x217   :  { %v1397_v21 = vmax.f32 %v1283_v57, 0.0  ;;  %v1286_v48 = vadd.f32 %v3388_v16, %v1285_v19  ;;  %2762 = vmatprep.mubr.bf16.mxu0 %v1457_v46  ;;  %v635_v57 = vadd.f32 %v3337_v58, %v3383_v15  ;;  %v627_v46 = vadd.f32 %v3383_v15, %v3339_v59 }
 0x218   :  { %v1431_v23 = vadd.f32 %v1399_v18, %v711_v17  ;;  %v1400_v24 = vmax.f32 %v1294_v47, 0.0  ;;  %2763 = vmatmul.mubr.bf16.vlgmr.msra.gmra.mrb[64].mxu0 %v1458_v45  ;;  %v638_v47 = vadd.f32 %v3341_v60, %v3383_v15 }
 0x219   :  { %v1429_v50 = vadd.f32 %v1397_v21, %v709_v20  ;;  %v1398_v26 = vmax.f32 %v1286_v48, 0.0  ;;  %v630_v48 = vadd.f32 %v3383_v15, %v3346_v62 }
 0x21a   :  { %v1432_v28 = vadd.f32 %v1400_v24, %v712_v22  ;;  %v719_v24 = vmax.f32 %v635_v57, 0.0 }
 0x21b   :  { %v1430_v30 = vadd.f32 %v1398_v26, %v710_v25  ;;  %v2724_v31 = vpop.f32.mrb[40].mxu1  ;;  %v717_v26 = vmax.f32 %v627_v46, 0.0  ;;  %v667_v46 = vadd.f32 %v3356_v3, %v3383_v15 }
 0x21c   :  { %v1307_v33 = vadd.f32 %v2724_v31, %v3388_v16  ;;  %v1298_v34 = vpop.f32.mrb[41].mxu1  ;;  %v1460_v35 = vpack.c.bf16 %v1432_v28, %v1431_v23  ;;  %v720_v28 = vmax.f32 %v638_v47, 0.0  ;;  %v718_v31 = vmax.f32 %v630_v48, 0.0 }
 0x21d   :  { %v1299_v36 = vadd.f32 %v3388_v16, %v1298_v34  ;;  %v2725_v37 = vpop.f32.mrb[42].mxu1  ;;  %v1459_v53 = vpack.c.bf16 %v1430_v30, %v1429_v50 }
 0x21e   :  { %v1403_v39 = vmax.f32 %v1307_v33, 0.0  ;;  %v1310_v52 = vadd.f32 %v2725_v37, %v3388_v16  ;;  %v1301_v40 = vpop.f32.mrb[43].mxu1  ;;  %v651_v33 = vadd.f32 %v3348_v63, %v3383_v15  ;;  %v654_v37 = vadd.f32 %v3352_v1, %v3383_v15 }
 0x21f   :  { %v1401_v42 = vmax.f32 %v1299_v36, 0.0  ;;  %v1302_v54 = vadd.f32 %v3388_v16, %v1301_v40  ;;  %2766 = vmatprep.mubr.bf16.mxu0 %v1459_v53 }
 0x220   :  { %v1435_v45 = vadd.f32 %v1403_v39, %v715_v38  ;;  %v1404_v49 = vmax.f32 %v1310_v52, 0.0  ;;  %2767 = vmatmul.mubr.bf16.gmra.mrb[68].mxu0 %v1460_v35  ;;  %v643_v35 = vadd.f32 %v3383_v15, %v3350_v0  ;;  %v646_v52 = vadd.f32 %v3383_v15, %v3354_v2 }
 0x221   :  { %v1433_v56 = vadd.f32 %v1401_v42, %v713_v41  ;;  %v1402_v55 = vmax.f32 %v1302_v54, 0.0  ;;  %v723_v42 = vmax.f32 %v651_v33, 0.0  ;;  %v675_v33 = vadd.f32 %v3383_v15, %v3366_v8 }
 0x222   :  { %v1436_v61 = vadd.f32 %v1404_v49, %v716_v43  ;;  %v722_v57 = vmax.f32 %v646_v52, 0.0 }
 0x223   :  { %v1434_v17 = vadd.f32 %v1402_v55, %v714_v51  ;;  %v2728_v18 = vpop.f32.mrb[44].mxu1  ;;  %v724_v51 = vmax.f32 %v654_v37, 0.0 }
 0x224   :  { %v1323_v19 = vadd.f32 %v2728_v18, %v3388_v16  ;;  %v1314_v20 = vpop.f32.mrb[45].mxu1  ;;  %v1462_v21 = vpack.c.bf16 %v1436_v61, %v1435_v45  ;;  %v721_v45 = vmax.f32 %v643_v35, 0.0  ;;  %v659_v18 = vadd.f32 %v3383_v15, %v3358_v4 }
 0x225   :  { %v1315_v22 = vadd.f32 %v3388_v16, %v1314_v20  ;;  %v2729_v23 = vpop.f32.mrb[46].mxu1  ;;  %v1461_v58 = vpack.c.bf16 %v1434_v17, %v1433_v56  ;;  %v670_v20 = vadd.f32 %v3360_v5, %v3383_v15 }
 0x226   :  { %v1407_v25 = vmax.f32 %v1323_v19, 0.0  ;;  %v1326_v59 = vadd.f32 %v2729_v23, %v3388_v16  ;;  %v1317_v50 = vpop.f32.mrb[47].mxu1  ;;  %v662_v23 = vadd.f32 %v3383_v15, %v3362_v6 }
 0x227   :  { %v1405_v27 = vmax.f32 %v1315_v22, 0.0  ;;  %v1318_v60 = vadd.f32 %v3388_v16, %v1317_v50  ;;  %2770 = vmatprep.mubr.bf16.mxu0 %v1461_v58 }
 0x228   :  { %v1439_v29 = vadd.f32 %v1407_v25, %v719_v24  ;;  %v1408_v30 = vmax.f32 %v1326_v59, 0.0  ;;  %2771 = vmatmul.mubr.bf16.gmra.mrb[72].mxu0 %v1462_v21  ;;  %v727_v25 = vmax.f32 %v667_v46, 0.0 }
 0x229   :  { %v1437_v62 = vadd.f32 %v1405_v27, %v717_v26  ;;  %v1406_v32 = vmax.f32 %v1318_v60, 0.0  ;;  %v725_v26 = vmax.f32 %v659_v18, 0.0  ;;  %v728_v60 = vmax.f32 %v670_v20, 0.0 }
 0x22a   :  { %v1440_v34 = vadd.f32 %v1408_v30, %v720_v28  ;;  %v726_v30 = vmax.f32 %v662_v23, 0.0 }
 0x22b   :  { %v1438_v44 = vadd.f32 %v1406_v32, %v718_v31  ;;  %v2732_v36 = vpop.f32.mrb[48].mxu1 }
 0x22c   :  { %v1339_v53 = vadd.f32 %v2732_v36, %v3388_v16  ;;  %v1330_v38 = vpop.f32.mrb[49].mxu1  ;;  %v1464_v39 = vpack.c.bf16 %v1440_v34, %v1439_v29 }
 0x22d   :  { %v1331_v40 = vadd.f32 %v3388_v16, %v1330_v38  ;;  %v2733_v41 = vpop.f32.mrb[50].mxu1  ;;  %v1463_v63 = vpack.c.bf16 %v1438_v44, %v1437_v62  ;;  %v683_v62 = vadd.f32 %v3364_v7, %v3383_v15  ;;  %v686_v44 = vadd.f32 %v3368_v9, %v3383_v15 }
 0x22e   :  { %v1411_v54 = vmax.f32 %v1339_v53, 0.0  ;;  %v1342_v0 = vadd.f32 %v2733_v41, %v3388_v16  ;;  %v1333_v43 = vpop.f32.mrb[51].mxu1  ;;  %v678_v38 = vadd.f32 %v3383_v15, %v3370_v10 }
 0x22f   :  { %v1409_v49 = vmax.f32 %v1331_v40, 0.0  ;;  %v1334_v1 = vadd.f32 %v3388_v16, %v1333_v43  ;;  %2774 = vmatprep.mubr.bf16.mxu0 %v1463_v63  ;;  %v731_v40 = vmax.f32 %v683_v62, 0.0 }
 0x230   :  { %v1443_v56 = vadd.f32 %v1411_v54, %v723_v42  ;;  %v1412_v55 = vmax.f32 %v1342_v0, 0.0  ;;  %2775 = vmatmul.mubr.bf16.gmra.mrb[76].mxu0 %v1464_v39  ;;  %v729_v42 = vmax.f32 %v675_v33, 0.0  ;;  %v732_v0 = vmax.f32 %v686_v44, 0.0 }
 0x231   :  { %v1441_v2 = vadd.f32 %v1409_v49, %v721_v45  ;;  %v1410_v61 = vmax.f32 %v1334_v1, 0.0  ;;  %v730_v49 = vmax.f32 %v678_v38, 0.0 }
 0x232   :  { %v1444_v17 = vadd.f32 %v1412_v55, %v724_v51  ;;  %v699_v51 = vadd.f32 %v3372_v11, %v3383_v15  ;;  %v691_v55 = vadd.f32 %v3383_v15, %v3374_v12 }
 0x233   :  { %v1442_v47 = vadd.f32 %v1410_v61, %v722_v57  ;;  %v2736_v19 = vpop.f32.mrb[52].mxu1  ;;  %v702_v61 = vadd.f32 %v3376_v13, %v3383_v15 }
 0x234   :  { %v1355_v21 = vadd.f32 %v2736_v19, %v3388_v16  ;;  %v1346_v48 = vpop.f32.mrb[53].mxu1  ;;  %v1466_v22 = vpack.c.bf16 %v1444_v17, %v1443_v56  ;;  %v733_v23 = vmax.f32 %v691_v55, 0.0 }
 0x235   :  { %v1347_v58 = vadd.f32 %v3388_v16, %v1346_v48  ;;  %v2737_v24 = vpop.f32.mrb[54].mxu1  ;;  %v1465_v3 = vpack.c.bf16 %v1442_v47, %v1441_v2  ;;  %v694_v47 = vadd.f32 %v3383_v15, %v3378_v14 }
 0x236   :  { %v1415_v59 = vmax.f32 %v1355_v21, 0.0  ;;  %v1358_v4 = vadd.f32 %v2737_v24, %v3388_v16  ;;  %v1349_v50 = vpop.f32.mrb[55].mxu1  ;;  %v735_v21 = vmax.f32 %v699_v51, 0.0  ;;  %v736_v24 = vmax.f32 %v702_v61, 0.0 }
 0x237   :  { %v1413_v27 = vmax.f32 %v1347_v58, 0.0  ;;  %v1350_v5 = vadd.f32 %v3388_v16, %v1349_v50  ;;  %2778 = vmatprep.mubr.bf16.mxu0 %v1465_v3 }
 0x238   :  { %v1447_v28 = vadd.f32 %v1415_v59, %v727_v25  ;;  %v1416_v29 = vmax.f32 %v1358_v4, 0.0  ;;  %2779 = vmatmul.mubr.bf16.gmra.mrb[80].mxu0 %v1466_v22  ;;  %v734_v59 = vmax.f32 %v694_v47, 0.0 }
 0x239   :  { %v1445_v6 = vadd.f32 %v1413_v27, %v725_v26  ;;  %v1414_v31 = vmax.f32 %v1350_v5, 0.0  ;;  %v2917_v5 = vld [vmem:[%s3616_s12 + $0x38] sm:$0xff]  }
 0x23a   :  { %v1448_v32 = vadd.f32 %v1416_v29, %v728_v60  ;;  %2808 = vmatprep.subr.bf16.mxu1 %v2917_v5 }
 0x23b   :  { %v1446_v34 = vadd.f32 %v1414_v31, %v726_v30  ;;  %v2740_v35 = vpop.f32.mrb[56].mxu1  ;;  %2809 = vmatpush3.bf16.msra.mxu1 %v2917_v5 }
 0x23c   :  { %v1371_v36 = vadd.f32 %v2740_v35, %v3388_v16  ;;  %v1362_v37 = vpop.f32.mrb[57].mxu1  ;;  %v1468_v53 = vpack.c.bf16 %v1448_v32, %v1447_v28 }
 0x23d   :  { %v1363_v39 = vadd.f32 %v3388_v16, %v1362_v37  ;;  %v2741_v52 = vpop.f32.mrb[58].mxu1  ;;  %v1467_v7 = vpack.c.bf16 %v1446_v34, %v1445_v6 }
 0x23e   :  { %v1419_v41 = vmax.f32 %v1371_v36, 0.0  ;;  %v1374_v8 = vadd.f32 %v2741_v52, %v3388_v16  ;;  %v1365_v63 = vpop.f32.mrb[59].mxu1 }
 0x23f   :  { %v1417_v54 = vmax.f32 %v1363_v39, 0.0  ;;  %v1366_v9 = vadd.f32 %v3388_v16, %v1365_v63  ;;  %2782 = vmatprep.mubr.bf16.mxu0 %v1467_v7 }
 0x240   :  { %v1451_v43 = vadd.f32 %v1419_v41, %v731_v40  ;;  %v1420_v45 = vmax.f32 %v1374_v8, 0.0  ;;  %2783 = vmatmul.mubr.bf16.gmra.mrb[84].mxu0 %v1468_v53 }
 0x241   :  { %v1449_v10 = vadd.f32 %v1417_v54, %v729_v42  ;;  %v1418_v1 = vmax.f32 %v1366_v9, 0.0 }
 0x242   :  { %v1452_v56 = vadd.f32 %v1420_v45, %v732_v0 }
 0x243   :  { %v1450_v57 = vadd.f32 %v1418_v1, %v730_v49  ;;  %v2744_v2 = vpop.f32.mrb[60].mxu1 }
 0x244   :  { %v1387_v46 = vadd.f32 %v2744_v2, %v3388_v16  ;;  %v1378_v17 = vpop.f32.mrb[61].mxu1  ;;  %v1470_v18 = vpack.c.bf16 %v1452_v56, %v1451_v43 }
 0x245   :  { %v1379_v19 = vadd.f32 %v3388_v16, %v1378_v17  ;;  %v2745_v20 = vpop.f32.mrb[62].mxu1  ;;  %v1469_v11 = vpack.c.bf16 %v1450_v57, %v1449_v10 }
 0x246   :  { %v1423_v48 = vmax.f32 %v1387_v46, 0.0  ;;  %v1390_v12 = vadd.f32 %v2745_v20, %v3388_v16  ;;  %v1381_v22 = vpop.f32.mrb[63].mxu1 }
 0x247   :  { %v1421_v58 = vmax.f32 %v1379_v19, 0.0  ;;  %v1382_v13 = vadd.f32 %v3388_v16, %v1381_v22  ;;  %2786 = vmatprep.mubr.bf16.mxu0 %v1469_v11  ;;  %v3488_v16 = vld [vmem:[%s3619_s11] ss:$0 sm:$0xff] }
 0x248   :  { %v1455_v3 = vadd.f32 %v1423_v48, %v735_v21  ;;  %v1424_v25 = vmax.f32 %v1390_v12, 0.0  ;;  %2787 = vmatmul.mubr.bf16.gmra.mrb[88].mxu0 %v1470_v18 }
 0x249   :  { %v1453_v14 = vadd.f32 %v1421_v58, %v733_v23  ;;  %v1422_v15 = vmax.f32 %v1382_v13, 0.0 }
 0x24a   :  { %v1456_v4 = vadd.f32 %v1424_v25, %v736_v24 }
 0x24b   :  { %v1454_v50 = vadd.f32 %v1422_v15, %v734_v59 }
 0x24c   :  { %v1472_v26 = vpack.c.bf16 %v1456_v4, %v1455_v3 }
 0x24d   :  { %v1471_v27 = vpack.c.bf16 %v1454_v50, %v1453_v14 }
 0x24f   :  { %2790 = vmatprep.mubr.bf16.mxu0 %v1471_v27 }
 0x250   :  { %2791 = vmatmul.mubr.bf16.gmra.mrb[92].mxu0 %v1472_v26 }
 0x2eb   :  { %v2764_v60 = vpop.f32.mrb[64].mxu0 }
 0x2ec   :  { %v1587_v28 = vadd.f32 %v2764_v60, %v3488_v16  ;;  %v1578_v29 = vpop.f32.mrb[65].mxu0 }
 0x2ed   :  { %v1579_v30 = vadd.f32 %v3488_v16, %v1578_v29  ;;  %v2765_v6 = vpop.f32.mrb[66].mxu0 }
 0x2ee   :  { %v1590_v31 = vadd.f32 %v2765_v6, %v3488_v16  ;;  %v1581_v62 = vpop.f32.mrb[67].mxu0  ;;  %v1707_v33 = vmax.f32 %v1587_v28, 0.0 }
 0x2ef   :  { %v1582_v32 = vadd.f32 %v3488_v16, %v1581_v62  ;;  %v1705_v35 = vmax.f32 %v1579_v30, 0.0 }
 0x2f0   :  { %v1708_v34 = vmax.f32 %v1590_v31, 0.0 }
 0x2f1   :  { %v1706_v44 = vmax.f32 %v1582_v32, 0.0 }
 0x2f2   :  { %v1738_v36 = vpack.c.bf16 %v1708_v34, %v1707_v33 }
 0x2f3   :  { %v1737_v37 = vpack.c.bf16 %v1706_v44, %v1705_v35  ;;  %v2768_v53 = vpop.f32.mrb[68].mxu0 }
 0x2f4   :  { %v1603_v38 = vadd.f32 %v2768_v53, %v3488_v16  ;;  %v1594_v39 = vpop.f32.mrb[69].mxu0 }
 0x2f5   :  { %v1595_v52 = vadd.f32 %v3488_v16, %v1594_v39  ;;  %v2769_v7 = vpop.f32.mrb[70].mxu0  ;;  %2810 = vmatprep.mubr.bf16.mxu1 %v1737_v37 }
 0x2f6   :  { %v1606_v40 = vadd.f32 %v2769_v7, %v3488_v16  ;;  %v1597_v41 = vpop.f32.mrb[71].mxu0  ;;  %2811 = vmatmul.mubr.bf16.vlgmr.msra.gmra.mrb[64].mxu1 %v1738_v36  ;;  %v1711_v63 = vmax.f32 %v1603_v38, 0.0 }
 0x2f7   :  { %v1598_v8 = vadd.f32 %v3488_v16, %v1597_v41  ;;  %v1709_v54 = vmax.f32 %v1595_v52, 0.0 }
 0x2f8   :  { %v1712_v42 = vmax.f32 %v1606_v40, 0.0 }
 0x2f9   :  { %v1710_v9 = vmax.f32 %v1598_v8, 0.0 }
 0x2fa   :  { %v1740_v0 = vpack.c.bf16 %v1712_v42, %v1711_v63 }
 0x2fb   :  { %v1739_v43 = vpack.c.bf16 %v1710_v9, %v1709_v54  ;;  %v2772_v45 = vpop.f32.mrb[72].mxu0 }
 0x2fc   :  { %v1619_v49 = vadd.f32 %v2772_v45, %v3488_v16  ;;  %v1610_v10 = vpop.f32.mrb[73].mxu0 }
 0x2fd   :  { %v1611_v1 = vadd.f32 %v3488_v16, %v1610_v10  ;;  %v2773_v51 = vpop.f32.mrb[74].mxu0  ;;  %2814 = vmatprep.mubr.bf16.mxu1 %v1739_v43 }
 0x2fe   :  { %v1622_v56 = vadd.f32 %v2773_v51, %v3488_v16  ;;  %v1613_v55 = vpop.f32.mrb[75].mxu0  ;;  %2815 = vmatmul.mubr.bf16.gmra.mrb[68].mxu1 %v1740_v0  ;;  %v1715_v2 = vmax.f32 %v1619_v49, 0.0 }
 0x2ff   :  { %v1614_v57 = vadd.f32 %v3488_v16, %v1613_v55  ;;  %v1713_v46 = vmax.f32 %v1611_v1, 0.0 }
 0x300   :  { %v1716_v61 = vmax.f32 %v1622_v56, 0.0 }
 0x301   :  { %v1714_v17 = vmax.f32 %v1614_v57, 0.0 }
 0x302   :  { %v1742_v18 = vpack.c.bf16 %v1716_v61, %v1715_v2 }
 0x303   :  { %v1741_v47 = vpack.c.bf16 %v1714_v17, %v1713_v46  ;;  %v2776_v19 = vpop.f32.mrb[76].mxu0 }
 0x304   :  { %v1635_v20 = vadd.f32 %v2776_v19, %v3488_v16  ;;  %v1626_v11 = vpop.f32.mrb[77].mxu0 }
 0x305   :  { %v1627_v21 = vadd.f32 %v3488_v16, %v1626_v11  ;;  %v2777_v48 = vpop.f32.mrb[78].mxu0  ;;  %2818 = vmatprep.mubr.bf16.mxu1 %v1741_v47 }
 0x306   :  { %v1638_v12 = vadd.f32 %v2777_v48, %v3488_v16  ;;  %v1629_v22 = vpop.f32.mrb[79].mxu0  ;;  %2819 = vmatmul.mubr.bf16.gmra.mrb[72].mxu1 %v1742_v18  ;;  %v1719_v58 = vmax.f32 %v1635_v20, 0.0 }
 0x307   :  { %v1630_v23 = vadd.f32 %v3488_v16, %v1629_v22  ;;  %v1717_v24 = vmax.f32 %v1627_v21, 0.0 }
 0x308   :  { %v1720_v13 = vmax.f32 %v1638_v12, 0.0 }
 0x309   :  { %v1718_v3 = vmax.f32 %v1630_v23, 0.0 }
 0x30a   :  { %v1744_v25 = vpack.c.bf16 %v1720_v13, %v1719_v58  ;;  %v3525_v58 = vld [vmem:[%s3620_s13] ss:$0 sm:$0xff] }
 0x30b   :  { %v1743_v59 = vpack.c.bf16 %v1718_v3, %v1717_v24  ;;  %v2780_v14 = vpop.f32.mrb[80].mxu0 }
 0x30c   :  { %v1651_v15 = vadd.f32 %v2780_v14, %v3488_v16  ;;  %v1642_v4 = vpop.f32.mrb[81].mxu0 }
 0x30d   :  { %v1643_v50 = vadd.f32 %v3488_v16, %v1642_v4  ;;  %v2781_v26 = vpop.f32.mrb[82].mxu0  ;;  %2822 = vmatprep.mubr.bf16.mxu1 %v1743_v59 }
 0x30e   :  { %v1654_v27 = vadd.f32 %v2781_v26, %v3488_v16  ;;  %v1645_v5 = vpop.f32.mrb[83].mxu0  ;;  %2823 = vmatmul.mubr.bf16.gmra.mrb[76].mxu1 %v1744_v25  ;;  %v1723_v28 = vmax.f32 %v1651_v15, 0.0 }
 0x30f   :  { %v1646_v60 = vadd.f32 %v3488_v16, %v1645_v5  ;;  %v1721_v30 = vmax.f32 %v1643_v50, 0.0 }
 0x310   :  { %v1724_v29 = vmax.f32 %v1654_v27, 0.0 }
 0x311   :  { %v1722_v6 = vmax.f32 %v1646_v60, 0.0 }
 0x312   :  { %v1746_v31 = vpack.c.bf16 %v1724_v29, %v1723_v28 }
 0x313   :  { %v1745_v62 = vpack.c.bf16 %v1722_v6, %v1721_v30  ;;  %v2784_v32 = vpop.f32.mrb[84].mxu0 }
 0x314   :  { %v1667_v33 = vadd.f32 %v2784_v32, %v3488_v16  ;;  %v1658_v34 = vpop.f32.mrb[85].mxu0 }
 0x315   :  { %v1659_v35 = vadd.f32 %v3488_v16, %v1658_v34  ;;  %v2785_v44 = vpop.f32.mrb[86].mxu0  ;;  %2826 = vmatprep.mubr.bf16.mxu1 %v1745_v62 }
 0x316   :  { %v1670_v36 = vadd.f32 %v2785_v44, %v3488_v16  ;;  %v1661_v37 = vpop.f32.mrb[87].mxu0  ;;  %2827 = vmatmul.mubr.bf16.gmra.mrb[80].mxu1 %v1746_v31  ;;  %v1727_v38 = vmax.f32 %v1667_v33, 0.0 }
 0x317   :  { %v1662_v53 = vadd.f32 %v3488_v16, %v1661_v37  ;;  %v1725_v52 = vmax.f32 %v1659_v35, 0.0 }
 0x318   :  { %v1728_v39 = vmax.f32 %v1670_v36, 0.0 }
 0x319   :  { %v1726_v7 = vmax.f32 %v1662_v53, 0.0 }
 0x31a   :  { %v1748_v40 = vpack.c.bf16 %v1728_v39, %v1727_v38 }
 0x31b   :  { %v1747_v41 = vpack.c.bf16 %v1726_v7, %v1725_v52  ;;  %v2788_v8 = vpop.f32.mrb[88].mxu0 }
 0x31c   :  { %v1683_v63 = vadd.f32 %v2788_v8, %v3488_v16  ;;  %v1674_v42 = vpop.f32.mrb[89].mxu0 }
 0x31d   :  { %v1675_v54 = vadd.f32 %v3488_v16, %v1674_v42  ;;  %v2789_v9 = vpop.f32.mrb[90].mxu0  ;;  %2830 = vmatprep.mubr.bf16.mxu1 %v1747_v41 }
 0x31e   :  { %v1686_v0 = vadd.f32 %v2789_v9, %v3488_v16  ;;  %v1677_v43 = vpop.f32.mrb[91].mxu0  ;;  %2831 = vmatmul.mubr.bf16.gmra.mrb[84].mxu1 %v1748_v40  ;;  %v1731_v49 = vmax.f32 %v1683_v63, 0.0 }
 0x31f   :  { %v1678_v45 = vadd.f32 %v3488_v16, %v1677_v43  ;;  %v1729_v1 = vmax.f32 %v1675_v54, 0.0 }
 0x320   :  { %v1732_v10 = vmax.f32 %v1686_v0, 0.0 }
 0x321   :  { %v1730_v51 = vmax.f32 %v1678_v45, 0.0 }
 0x322   :  { %v1750_v56 = vpack.c.bf16 %v1732_v10, %v1731_v49 }
 0x323   :  { %v1749_v55 = vpack.c.bf16 %v1730_v51, %v1729_v1  ;;  %v2792_v57 = vpop.f32.mrb[92].mxu0 }
 0x324   :  { %v1699_v2 = vadd.f32 %v2792_v57, %v3488_v16  ;;  %v1690_v61 = vpop.f32.mrb[93].mxu0 }
 0x325   :  { %v1691_v46 = vadd.f32 %v3488_v16, %v1690_v61  ;;  %v2793_v17 = vpop.f32.mrb[94].mxu0  ;;  %2834 = vmatprep.mubr.bf16.mxu1 %v1749_v55 }
 0x326   :  { %v1702_v18 = vadd.f32 %v2793_v17, %v3488_v16  ;;  %v1693_v47 = vpop.f32.mrb[95].mxu0  ;;  %2835 = vmatmul.mubr.bf16.gmra.mrb[88].mxu1 %v1750_v56  ;;  %v1735_v20 = vmax.f32 %v1699_v2, 0.0 }
 0x327   :  { %v1694_v19 = vadd.f32 %v3488_v16, %v1693_v47  ;;  %v1733_v21 = vmax.f32 %v1691_v46, 0.0 }
 0x328   :  { %v1736_v11 = vmax.f32 %v1702_v18, 0.0 }
 0x329   :  { %v1734_v48 = vmax.f32 %v1694_v19, 0.0 }
 0x32a   :  { %v1752_v12 = vpack.c.bf16 %v1736_v11, %v1735_v20 }
 0x32b   :  { %v1751_v22 = vpack.c.bf16 %v1734_v48, %v1733_v21 }
 0x32d   :  { %2838 = vmatprep.mubr.bf16.mxu1 %v1751_v22 }
 0x32e   :  { %2839 = vmatmul.mubr.bf16.gmra.mrb[92].mxu1 %v1752_v12 }
 0x3c9   :  { %v2812_v23 = vpop.f32.mrb[64].mxu1 }
 0x3ca   :  { %v1858_v13 = vpop.f32.mrb[65].mxu1  ;;  %v1867_v3 = vadd.f32 %v2812_v23, %v3525_v58 }
 0x3cb   :  { %v2813_v24 = vpop.f32.mrb[66].mxu1  ;;  %v1859_v59 = vadd.f32 %v3525_v58, %v1858_v13 }
 0x3cc   :  { %v1870_v16 = vadd.f32 %v2813_v24, %v3525_v58  ;;  %v1861_v25 = vpop.f32.mrb[67].mxu1 }
 0x3cd   :  { %v1862_v14 = vadd.f32 %v3525_v58, %v1861_v25 }
 0x3ce   :  { %v2335_v15 = vpack.c.bf16 %v1870_v16, %v1867_v3 }
 0x3cf   :  { %v2330_v4 = vpack.c.bf16 %v1862_v14, %v1859_v59 }
 0x3d0   :  { %2407 = vst [vmem:[%s3621_s14 + $0x8] sm:$0xff] %v2335_v15  }
 0x3d1   :  { %2331 = vst [vmem:[%s3621_s14] sm:$0xff] %v2330_v4   ;;  %v2816_v50 = vpop.f32.mrb[68].mxu1 }
 0x3d2   :  { %v1874_v26 = vpop.f32.mrb[69].mxu1  ;;  %v1883_v5 = vadd.f32 %v2816_v50, %v3525_v58 }
 0x3d3   :  { %v2817_v27 = vpop.f32.mrb[70].mxu1  ;;  %v1875_v29 = vadd.f32 %v3525_v58, %v1874_v26 }
 0x3d4   :  { %v1886_v60 = vadd.f32 %v2817_v27, %v3525_v58  ;;  %v1877_v28 = vpop.f32.mrb[71].mxu1 }
 0x3d5   :  { %v1878_v30 = vadd.f32 %v3525_v58, %v1877_v28 }
 0x3d6   :  { %v2345_v6 = vpack.c.bf16 %v1886_v60, %v1883_v5 }
 0x3d7   :  { %v2340_v31 = vpack.c.bf16 %v1878_v30, %v1875_v29 }
 0x3d8   :  { %2409 = vst [vmem:[%s3621_s14 + $0x18] sm:$0xff] %v2345_v6  }
 0x3d9   :  { %2408 = vst [vmem:[%s3621_s14 + $0x10] sm:$0xff] %v2340_v31   ;;  %v2820_v62 = vpop.f32.mrb[72].mxu1 }
 0x3da   :  { %v1890_v32 = vpop.f32.mrb[73].mxu1  ;;  %v1899_v34 = vadd.f32 %v2820_v62, %v3525_v58 }
 0x3db   :  { %v2821_v33 = vpop.f32.mrb[74].mxu1  ;;  %v1891_v36 = vadd.f32 %v3525_v58, %v1890_v32 }
 0x3dc   :  { %v1902_v35 = vadd.f32 %v2821_v33, %v3525_v58  ;;  %v1893_v44 = vpop.f32.mrb[75].mxu1 }
 0x3dd   :  { %v1894_v37 = vadd.f32 %v3525_v58, %v1893_v44 }
 0x3de   :  { %v2355_v53 = vpack.c.bf16 %v1902_v35, %v1899_v34 }
 0x3df   :  { %v2350_v38 = vpack.c.bf16 %v1894_v37, %v1891_v36 }
 0x3e0   :  { %2411 = vst [vmem:[%s3621_s14 + $0x28] sm:$0xff] %v2355_v53  }
 0x3e1   :  { %2410 = vst [vmem:[%s3621_s14 + $0x20] sm:$0xff] %v2350_v38   ;;  %v2824_v39 = vpop.f32.mrb[76].mxu1 }
 0x3e2   :  { %v1906_v52 = vpop.f32.mrb[77].mxu1  ;;  %v1915_v40 = vadd.f32 %v2824_v39, %v3525_v58 }
 0x3e3   :  { %v2825_v7 = vpop.f32.mrb[78].mxu1  ;;  %v1907_v63 = vadd.f32 %v3525_v58, %v1906_v52 }
 0x3e4   :  { %v1918_v41 = vadd.f32 %v2825_v7, %v3525_v58  ;;  %v1909_v8 = vpop.f32.mrb[79].mxu1 }
 0x3e5   :  { %v1910_v42 = vadd.f32 %v3525_v58, %v1909_v8 }
 0x3e6   :  { %v2365_v54 = vpack.c.bf16 %v1918_v41, %v1915_v40 }
 0x3e7   :  { %v2360_v9 = vpack.c.bf16 %v1910_v42, %v1907_v63 }
 0x3e8   :  { %2413 = vst [vmem:[%s3621_s14 + $0x38] sm:$0xff] %v2365_v54  }
 0x3e9   :  { %2412 = vst [vmem:[%s3621_s14 + $0x30] sm:$0xff] %v2360_v9   ;;  %v2828_v0 = vpop.f32.mrb[80].mxu1 }
 0x3ea   :  { %v1922_v43 = vpop.f32.mrb[81].mxu1  ;;  %v1931_v49 = vadd.f32 %v2828_v0, %v3525_v58 }
 0x3eb   :  { %v2829_v45 = vpop.f32.mrb[82].mxu1  ;;  %v1923_v51 = vadd.f32 %v3525_v58, %v1922_v43 }
 0x3ec   :  { %v1934_v10 = vadd.f32 %v2829_v45, %v3525_v58  ;;  %v1925_v1 = vpop.f32.mrb[83].mxu1 }
 0x3ed   :  { %v1926_v56 = vadd.f32 %v3525_v58, %v1925_v1 }
 0x3ee   :  { %v2375_v55 = vpack.c.bf16 %v1934_v10, %v1931_v49 }
 0x3ef   :  { %v2370_v57 = vpack.c.bf16 %v1926_v56, %v1923_v51 }
 0x3f0   :  { %2415 = vst [vmem:[%s3621_s14 + $0x48] sm:$0xff] %v2375_v55  }
 0x3f1   :  { %2414 = vst [vmem:[%s3621_s14 + $0x40] sm:$0xff] %v2370_v57   ;;  %v2832_v2 = vpop.f32.mrb[84].mxu1 }
 0x3f2   :  { %v1938_v61 = vpop.f32.mrb[85].mxu1  ;;  %v1947_v17 = vadd.f32 %v2832_v2, %v3525_v58 }
 0x3f3   :  { %v2833_v46 = vpop.f32.mrb[86].mxu1  ;;  %v1939_v19 = vadd.f32 %v3525_v58, %v1938_v61 }
 0x3f4   :  { %v1950_v18 = vadd.f32 %v2833_v46, %v3525_v58  ;;  %v1941_v47 = vpop.f32.mrb[87].mxu1 }
 0x3f5   :  { %v1942_v20 = vadd.f32 %v3525_v58, %v1941_v47 }
 0x3f6   :  { %v2385_v11 = vpack.c.bf16 %v1950_v18, %v1947_v17 }
 0x3f7   :  { %v2380_v21 = vpack.c.bf16 %v1942_v20, %v1939_v19 }
 0x3f8   :  { %2417 = vst [vmem:[%s3621_s14 + $0x58] sm:$0xff] %v2385_v11  }
 0x3f9   :  { %2416 = vst [vmem:[%s3621_s14 + $0x50] sm:$0xff] %v2380_v21   ;;  %v2836_v48 = vpop.f32.mrb[88].mxu1 }
 0x3fa   :  { %v1954_v12 = vpop.f32.mrb[89].mxu1  ;;  %v1963_v23 = vadd.f32 %v2836_v48, %v3525_v58 }
 0x3fb   :  { %v2837_v22 = vpop.f32.mrb[90].mxu1  ;;  %v1955_v3 = vadd.f32 %v3525_v58, %v1954_v12 }
 0x3fc   :  { %v1966_v13 = vadd.f32 %v2837_v22, %v3525_v58  ;;  %v1957_v24 = vpop.f32.mrb[91].mxu1 }
 0x3fd   :  { %v1958_v16 = vadd.f32 %v3525_v58, %v1957_v24 }
 0x3fe   :  { %v2395_v25 = vpack.c.bf16 %v1966_v13, %v1963_v23 }
 0x3ff   :  { %v2390_v59 = vpack.c.bf16 %v1958_v16, %v1955_v3 }
 0x400   :  { %2419 = vst [vmem:[%s3621_s14 + $0x68] sm:$0xff] %v2395_v25  }
 0x401   :  { %2418 = vst [vmem:[%s3621_s14 + $0x60] sm:$0xff] %v2390_v59   ;;  %v2840_v14 = vpop.f32.mrb[92].mxu1 }
 0x402   :  { %v1970_v15 = vpop.f32.mrb[93].mxu1  ;;  %v1979_v50 = vadd.f32 %v2840_v14, %v3525_v58 }
 0x403   :  { %v2841_v4 = vpop.f32.mrb[94].mxu1  ;;  %v1971_v5 = vadd.f32 %v3525_v58, %v1970_v15 }
 0x404   :  { %v1982_v26 = vadd.f32 %v2841_v4, %v3525_v58  ;;  %v1973_v27 = vpop.f32.mrb[95].mxu1 }
 0x405   :  { %v1974_v60 = vadd.f32 %v3525_v58, %v1973_v27 }
 0x406   :  { %v2405_v28 = vpack.c.bf16 %v1982_v26, %v1979_v50 }
 0x407   :  { %v2400_v29 = vpack.c.bf16 %v1974_v60, %v1971_v5 }
 0x408   :  { %2421 = vst [vmem:[%s3621_s14 + $0x78] sm:$0xff] %v2405_v28  }
 0x409   :  { %2420 = vst [vmem:[%s3621_s14 + $0x70] sm:$0xff] %v2400_v29  }

</bundles_post_ra>
